<compile_context>
chip_gen: v7x
topology: tpu7x:2x2x1
jax: 0.10.0
libtpu: 0.0.40
codegen_flags: <defaults>
</compile_context>

<pallas_src>
import jax
import jax.numpy as jnp
from jax.experimental import pallas as pl
from jax.experimental.pallas import tpu as pltpu

CLIP_DIM = 768    # ViT-L-14 image embedding dim
HID = 384
BN_EPS = 1e-5
TM_MAX = 512      # feat_acc = TM_MAX*768*4 B = 1.5 MiB; keeps epilogue cheap
EPI_SUB = 128     # epilogue row sub-block (vreg-pressure guard)


def _round_up(x, m):
    return (x + m - 1) // m * m


def _chip_budget():
    """Returns (tk_max, vmem_limit_bytes) derived from the chip's VMEM size."""
    try:
        vmem_cap = int(pltpu.get_tpu_info().vmem_capacity_bytes)
    except Exception:
        vmem_cap = 64 * 1024 * 1024           # conservative: assume v7x
    if vmem_cap >= 96 * 1024 * 1024:          # v5e / v6e: 128 MiB VMEM
        return 8192, 80 * 1024 * 1024
    return 4096, 32 * 1024 * 1024             # v7x: 64 MiB VMEM


def mh_safety_kernel(x_ref, we_ref, w1_ref, b1_ref, w2row_ref, b2_ref,
                     out_ref, feat_acc):
    k = pl.program_id(1)

    @pl.when(k == 0)
    def _():
        feat_acc[...] = jnp.zeros_like(feat_acc)

    # encode_image stand-in, K-tiled: [tm, tk]bf16 @ [tk, 768]bf16 -> f32 acc.
    feat_acc[...] += jnp.dot(x_ref[...], we_ref[...],
                             preferred_element_type=jnp.float32)

    # Projection head + sigmoid only on the last K step.
    @pl.when(k == pl.num_programs(1) - 1)
    def _():
        tm = feat_acc.shape[0]
        sub = EPI_SUB if (tm > EPI_SUB and tm % EPI_SUB == 0) else tm
        w1 = w1_ref[...]          # [768, 384] bf16 (resident)
        b1 = b1_ref[...]          # [1, 384]  f32 (encode bias pre-folded)
        w2 = w2row_ref[...]       # [1, 384]  f32 (BN scale pre-folded)
        b2 = b2_ref[...]          # [1, 1]    f32 (BN shift pre-folded)
        # Sub-block the epilogue via static slices of the VMEM accumulator so
        # a large tm does not create a huge one-shot [tm,384] f32 intermediate.
        for s in range(tm // sub):
            lo = s * sub
            feats = feat_acc[lo:lo + sub, :]                      # [sub,768] f32
            # Linear(768, 384) + ReLU  (Dropout(0.5) is identity in eval).
            h = jnp.dot(feats.astype(jnp.bfloat16), w1,
                        preferred_element_type=jnp.float32) + b1
            h = jnp.maximum(h, 0.0)
            # BatchNorm1d(eval) folded into w2/b2; Linear(384,1) as a VPU
            # multiply + lane reduce (avoids an N=1 masked-store MXU matmul).
            logit = jnp.sum(h * w2, axis=-1, keepdims=True) + b2
            out_ref[lo:lo + sub, :] = jax.nn.sigmoid(logit)


def init_params(key, in_feat):
    ks = jax.random.split(key, 10)
    return {
        # encode_image stand-in
        "we":    0.02 * jax.random.normal(ks[0], (in_feat, CLIP_DIM), jnp.float32),
        "be":    0.01 * jax.random.normal(ks[1], (1, CLIP_DIM), jnp.float32),
        # Linear(768, 384)
        "w1":    0.02 * jax.random.normal(ks[2], (CLIP_DIM, HID), jnp.float32),
        "b1":    0.01 * jax.random.normal(ks[3], (1, HID), jnp.float32),
        # BatchNorm1d(384): weight, bias, running_mean, running_var
        "gamma": 1.0 + 0.05 * jax.random.normal(ks[4], (1, HID), jnp.float32),
        "beta":  0.05 * jax.random.normal(ks[5], (1, HID), jnp.float32),
        "mean":  0.05 * jax.random.normal(ks[6], (1, HID), jnp.float32),
        "var":   jnp.abs(0.5 * jax.random.normal(ks[7], (1, HID), jnp.float32)) + 0.5,
        # Linear(384, 1)
        "w2":    0.02 * jax.random.normal(ks[8], (HID, 1), jnp.float32),
        "b2":    0.01 * jax.random.normal(ks[9], (1, 1), jnp.float32),
    }


def prepare_params(params, in_feat, *, tk=None):
    """One-time weight preprocessing, hoisted out of the per-call path:
    eval-mode BN / encode-bias folding, bf16 casts, and zero-padding of the
    encode weight to the chip-appropriate K-tile multiple."""
    if tk is None:
        tk_max, _ = _chip_budget()
        tk = min(tk_max, _round_up(in_feat, 128))
    Kp = _round_up(in_feat, tk)

    s = params["gamma"] * jax.lax.rsqrt(params["var"] + BN_EPS)              # [1,HID]
    b1f = (params["b1"] + params["be"] @ params["w1"]).astype(jnp.float32)   # [1,HID]
    w2row = (s * params["w2"][:, 0][None, :]).astype(jnp.float32)            # [1,HID]
    b2f = (params["b2"]
           + (params["beta"] - params["mean"] * s) @ params["w2"]).astype(jnp.float32)

    we_bf = params["we"].astype(jnp.bfloat16)
    if Kp != in_feat:
        we_bf = jnp.zeros((Kp, CLIP_DIM), jnp.bfloat16).at[:in_feat, :].set(we_bf)
    w1_bf = params["w1"].astype(jnp.bfloat16)

    return {"we_p": we_bf, "w1_b": w1_bf, "b1f": b1f, "w2row": w2row,
            "b2f": b2f, "K": in_feat, "Kp": Kp, "tk": tk}


def mh_safety_forward(image_nchw, prep, *, tm=None):
    """image_nchw: [B, C, H, W] float32 -> sigmoid scores [B, 1] float32."""
    B = image_nchw.shape[0]
    x = image_nchw.reshape(B, -1)
    K = x.shape[1]
    assert K == prep["K"], (K, prep["K"])
    Kp, tk = prep["Kp"], prep["tk"]
    _, vmem_limit = _chip_budget()

    # One M tile whenever possible: `we` (the dominant HBM stream) is read
    # once per M tile, so minimizing M tiles minimizes total HBM traffic.
    if tm is None:
        if B <= EPI_SUB:
            tm = _round_up(max(B, 8), 8)
        else:
            tm = min(TM_MAX, _round_up(B, EPI_SUB))
    Bp = _round_up(B, tm)

    # Per-call activation cast/pad only (weights are pre-packed in `prep`).
    x_b = x.astype(jnp.bfloat16)
    if (Bp, Kp) != (B, K):
        x_b = jnp.zeros((Bp, Kp), jnp.bfloat16).at[:B, :K].set(x_b)

    n_m, n_k = Bp // tm, Kp // tk
    grid = (n_m, n_k)

    flops = 2 * Bp * (Kp * CLIP_DIM + CLIP_DIM * HID + HID)
    bytes_accessed = (Bp * Kp * 2                       # x, streamed once
                      + n_m * Kp * CLIP_DIM * 2         # we, once per M tile
                      + CLIP_DIM * HID * 2              # w1
                      + Bp * 4 + 3 * HID * 4 + 4)       # out + folded vectors

    out = pl.pallas_call(
        mh_safety_kernel,
        out_shape=jax.ShapeDtypeStruct((Bp, 1), jnp.float32),
        grid_spec=pltpu.PrefetchScalarGridSpec(
            num_scalar_prefetch=0,
            grid=grid,
            in_specs=[
                pl.BlockSpec((tm, tk), lambda i, k: (i, k)),         # x tile
                pl.BlockSpec((tk, CLIP_DIM), lambda i, k: (k, 0)),   # we tile
                pl.BlockSpec((CLIP_DIM, HID), lambda i, k: (0, 0)),  # w1 (resident)
                pl.BlockSpec((1, HID), lambda i, k: (0, 0)),         # b1' (be folded)
                pl.BlockSpec((1, HID), lambda i, k: (0, 0)),         # w2 row (BN folded)
                pl.BlockSpec((1, 1), lambda i, k: (0, 0)),           # b2' (BN folded)
            ],
            out_specs=pl.BlockSpec((tm, 1), lambda i, k: (i, 0)),
            scratch_shapes=[pltpu.VMEM((tm, CLIP_DIM), jnp.float32)],
        ),
        compiler_params=pltpu.CompilerParams(
            dimension_semantics=("parallel", "arbitrary"),
            vmem_limit_bytes=vmem_limit,
        ),
        cost_estimate=pl.CostEstimate(
            flops=flops, transcendentals=Bp, bytes_accessed=bytes_accessed),
    )(x_b, prep["we_p"], prep["w1_b"], prep["b1f"], prep["w2row"], prep["b2f"])

    return out[:B]


if __name__ == "__main__":
    key = jax.random.PRNGKey(0)
    k_img, k_par = jax.random.split(key)

    # Small image: [B=2, C=3, H=16, W=16]  (3*16*16 = 768 flattened features)
    B, C, Hs, Ws = 2, 3, 16, 16
    image = jax.random.normal(k_img, (B, C, Hs, Ws), jnp.float32)
    params = init_params(k_par, in_feat=C * Hs * Ws)
    prep = prepare_params(params, in_feat=C * Hs * Ws)   # one-time weight prep

    out = jax.block_until_ready(mh_safety_forward(image, prep))

    # Pure-JAX f32 reference (eval-mode semantics) for a loose numeric check.
    x = image.reshape(B, -1)
    feats = x @ params["we"] + params["be"]
    h = jnp.maximum(feats @ params["w1"] + params["b1"], 0.0)
    s = params["gamma"] * jax.lax.rsqrt(params["var"] + BN_EPS)
    h = (h - params["mean"]) * s + params["beta"]
    ref = jax.nn.sigmoid(h @ params["w2"] + params["b2"])

    assert out.shape == (B, 1) and out.dtype == jnp.float32
    assert bool(jnp.all((out >= 0.0) & (out <= 1.0)))
    assert bool(jnp.max(jnp.abs(out - ref)) < 1e-2)
    print("KERNEL_OK")
</pallas_src>

<mosaic_0001>
module attributes {stable_mosaic.version = 11 : i64} {
  func.func @mh_safety_kernel(%arg0: i32, %arg1: i32, %arg2: memref<8x768xbf16, #tpu.memory_space<vmem>>, %arg3: memref<768x768xbf16, #tpu.memory_space<vmem>>, %arg4: memref<768x384xbf16, #tpu.memory_space<vmem>>, %arg5: memref<1x384xf32, #tpu.memory_space<vmem>>, %arg6: memref<1x384xf32, #tpu.memory_space<vmem>>, %arg7: memref<1x1xf32, #tpu.memory_space<vmem>>, %arg8: memref<8x1xf32, #tpu.memory_space<vmem>>, %arg9: memref<8x768xf32, #tpu.memory_space<vmem>>) attributes {dimension_semantics = [#tpu.dimension_semantics<parallel>, #tpu.dimension_semantics<arbitrary>], iteration_bounds = array<i64: 1, 1>, scalar_prefetch = 0 : i64, scratch_operands = 1 : i64, tpu.core_type = #tpu.core_type<tc>, window_params = [{transform_indices = @transform_0, window_bounds = array<i64: 8, 768>}, {transform_indices = @transform_1, window_bounds = array<i64: 768, 768>}, {pipeline_mode = #tpu.pipeline_mode<synchronous>, transform_indices = @transform_2, window_bounds = array<i64: 768, 384>}, {pipeline_mode = #tpu.pipeline_mode<synchronous>, transform_indices = @transform_3, window_bounds = array<i64: 1, 384>}, {pipeline_mode = #tpu.pipeline_mode<synchronous>, transform_indices = @transform_4, window_bounds = array<i64: 1, 384>}, {pipeline_mode = #tpu.pipeline_mode<synchronous>, transform_indices = @transform_5, window_bounds = array<i64: 1, 1>}, {transform_indices = @transform_6, window_bounds = array<i64: 8, 1>}]} {
    %c0_i32 = arith.constant 0 : i32
    %0 = arith.cmpi eq, %arg1, %c0_i32 : i32
    %1 = arith.extui %0 : i1 to i32
    %c0_i32_0 = arith.constant 0 : i32
    %2 = arith.cmpi ne, %1, %c0_i32_0 : i32
    scf.if %2 {
      %cst_10 = arith.constant 0.000000e+00 : f32
      %12 = vector.broadcast %cst_10 : f32 to vector<8x768xf32>
      %c0_11 = arith.constant 0 : index
      %c0_12 = arith.constant 0 : index
      %13 = vector.load %arg9[%c0_11, %c0_12] : memref<8x768xf32, #tpu.memory_space<vmem>>, vector<8x768xf32>
      tpu.vector_store %arg9[%c0_11, %c0_12], %12 {strides = array<i32>} : memref<8x768xf32, #tpu.memory_space<vmem>>, vector<8x768xf32>,
    } else {
    }
    %c0 = arith.constant 0 : index
    %c0_1 = arith.constant 0 : index
    %3 = vector.load %arg9[%c0, %c0_1] : memref<8x768xf32, #tpu.memory_space<vmem>>, vector<8x768xf32>
    %c0_2 = arith.constant 0 : index
    %c0_3 = arith.constant 0 : index
    %4 = vector.load %arg2[%c0_2, %c0_3] : memref<8x768xbf16, #tpu.memory_space<vmem>>, vector<8x768xbf16>
    %c0_4 = arith.constant 0 : index
    %c0_5 = arith.constant 0 : index
    %5 = vector.load %arg3[%c0_4, %c0_5] : memref<768x768xbf16, #tpu.memory_space<vmem>>, vector<768x768xbf16>
    %cst = arith.constant dense<0.000000e+00> : vector<8x768xf32>
    %6 = tpu.matmul %4, %5, %cst {dimension_numbers = #tpu.dot_dimension_numbers<[1], [0], [0], [1], [0, 0, 1, 1], [], []>} : vector<8x768xbf16>, vector<768x768xbf16>, vector<8x768xf32> -> vector<8x768xf32>
    %7 = arith.addf %3, %6 : vector<8x768xf32>
    %c0_6 = arith.constant 0 : index
    %c0_7 = arith.constant 0 : index
    %8 = vector.load %arg9[%c0_6, %c0_7] : memref<8x768xf32, #tpu.memory_space<vmem>>, vector<8x768xf32>
    tpu.vector_store %arg9[%c0_6, %c0_7], %7 {strides = array<i32>} : memref<8x768xf32, #tpu.memory_space<vmem>>, vector<8x768xf32>,
    %c0_i32_8 = arith.constant 0 : i32
    %9 = arith.cmpi eq, %arg1, %c0_i32_8 : i32
    %10 = arith.extui %9 : i1 to i32
    %c0_i32_9 = arith.constant 0 : i32
    %11 = arith.cmpi ne, %10, %c0_i32_9 : i32
    scf.if %11 {
      %c0_10 = arith.constant 0 : index
      %c0_11 = arith.constant 0 : index
      %12 = vector.load %arg4[%c0_10, %c0_11] : memref<768x384xbf16, #tpu.memory_space<vmem>>, vector<768x384xbf16>
      %c0_12 = arith.constant 0 : index
      %c0_13 = arith.constant 0 : index
      %13 = vector.load %arg5[%c0_12, %c0_13] : memref<1x384xf32, #tpu.memory_space<vmem>>, vector<1x384xf32>
      %c0_14 = arith.constant 0 : index
      %c0_15 = arith.constant 0 : index
      %14 = vector.load %arg6[%c0_14, %c0_15] : memref<1x384xf32, #tpu.memory_space<vmem>>, vector<1x384xf32>
      %c0_16 = arith.constant 0 : index
      %c0_17 = arith.constant 0 : index
      %15 = vector.load %arg7[%c0_16, %c0_17] : memref<1x1xf32, #tpu.memory_space<vmem>>, vector<1x1xf32>
      %c0_18 = arith.constant 0 : index
      %c0_19 = arith.constant 0 : index
      %16 = vector.load %arg9[%c0_18, %c0_19] : memref<8x768xf32, #tpu.memory_space<vmem>>, vector<8x768xf32>
      %17 = arith.truncf %16 : vector<8x768xf32> to vector<8x768xbf16>
      %cst_20 = arith.constant dense<0.000000e+00> : vector<8x384xf32>
      %18 = tpu.matmul %17, %12, %cst_20 {dimension_numbers = #tpu.dot_dimension_numbers<[1], [0], [0], [1], [0, 0, 1, 1], [], []>} : vector<8x768xbf16>, vector<768x384xbf16>, vector<8x384xf32> -> vector<8x384xf32>
      %19 = vector.broadcast %13 : vector<1x384xf32> to vector<8x384xf32>
      %20 = arith.addf %18, %19 : vector<8x384xf32>
      %cst_21 = arith.constant 0.000000e+00 : f32
      %21 = vector.broadcast %cst_21 : f32 to vector<8x384xf32>
      %22 = arith.maximumf %20, %21 : vector<8x384xf32>
      %23 = vector.broadcast %14 : vector<1x384xf32> to vector<8x384xf32>
      %24 = arith.mulf %22, %23 : vector<8x384xf32>
      %cst_22 = arith.constant dense<0.000000e+00> : vector<8xf32>
      %25 = vector.multi_reduction <add>, %24, %cst_22 [1] : vector<8x384xf32> to vector<8xf32>
      %26 = vector.shape_cast %25 : vector<8xf32> to vector<8x1xf32>
      %27 = vector.broadcast %15 : vector<1x1xf32> to vector<8x1xf32>
      %28 = arith.addf %26, %27 : vector<8x1xf32>
      %29 = arith.negf %28 : vector<8x1xf32>
      %30 = math.exp %29 : vector<8x1xf32>
      %cst_23 = arith.constant 1.000000e+00 : f32
      %31 = vector.broadcast %cst_23 : f32 to vector<8x1xf32>
      %32 = arith.addf %31, %30 : vector<8x1xf32>
      %33 = arith.divf %31, %32 : vector<8x1xf32>
      %c0_24 = arith.constant 0 : index
      %c0_25 = arith.constant 0 : index
      %34 = vector.load %arg8[%c0_24, %c0_25] : memref<8x1xf32, #tpu.memory_space<vmem>>, vector<8x1xf32>
      tpu.vector_store %arg8[%c0_24, %c0_25], %33 {strides = array<i32>} : memref<8x1xf32, #tpu.memory_space<vmem>>, vector<8x1xf32>,
    } else {
    }
    return
  }
  func.func @transform_0(%arg0: i32, %arg1: i32) -> (i32, i32) {
    %c0_i32 = arith.constant 0 : i32
    return %arg0, %arg1 : i32, i32
  }
  func.func @transform_1(%arg0: i32, %arg1: i32) -> (i32, i32) {
    %c0_i32 = arith.constant 0 : i32
    %c0_i32_0 = arith.constant 0 : i32
    return %arg1, %c0_i32 : i32, i32
  }
  func.func @transform_2(%arg0: i32, %arg1: i32) -> (i32, i32) {
    %c0_i32 = arith.constant 0 : i32
    %c0_i32_0 = arith.constant 0 : i32
    %c0_i32_1 = arith.constant 0 : i32
    return %c0_i32, %c0_i32_0 : i32, i32
  }
  func.func @transform_3(%arg0: i32, %arg1: i32) -> (i32, i32) {
    %c0_i32 = arith.constant 0 : i32
    %c0_i32_0 = arith.constant 0 : i32
    %c0_i32_1 = arith.constant 0 : i32
    return %c0_i32, %c0_i32_0 : i32, i32
  }
  func.func @transform_4(%arg0: i32, %arg1: i32) -> (i32, i32) {
    %c0_i32 = arith.constant 0 : i32
    %c0_i32_0 = arith.constant 0 : i32
    %c0_i32_1 = arith.constant 0 : i32
    return %c0_i32, %c0_i32_0 : i32, i32
  }
  func.func @transform_5(%arg0: i32, %arg1: i32) -> (i32, i32) {
    %c0_i32 = arith.constant 0 : i32
    %c0_i32_0 = arith.constant 0 : i32
    %c0_i32_1 = arith.constant 0 : i32
    return %c0_i32, %c0_i32_0 : i32, i32
  }
  func.func @transform_6(%arg0: i32, %arg1: i32) -> (i32, i32) {
    %c0_i32 = arith.constant 0 : i32
    %c0_i32_0 = arith.constant 0 : i32
    return %arg0, %c0_i32 : i32, i32
  }
}

</mosaic_0001>

<bundles_post_ra>
// kernel: tpu_custom_call.1
= control target key start
LH: loop header
LB: loop body
LE: loop exit
PB: predicated region body
PF: predicated region fallthrough
CT: control target
= control target key end

     0   :  { %s4985_s0 = inlined_call_operand.hbm [shape: bf16[8,768], index: 0, kind: input, shape index: {}]   ;;  %s4986_s1 = inlined_call_operand.hbm [shape: bf16[768,768], index: 1, kind: input, shape index: {}]   ;;  %s4987_s2 = inlined_call_operand.hbm [shape: bf16[768,384], index: 2, kind: input, shape index: {}]   ;;  %s4988_s3 = inlined_call_operand.hbm [shape: f32[1,384], index: 3, kind: input, shape index: {}]   ;;  %s4989_s4 = inlined_call_operand.hbm [shape: f32[1,384], index: 4, kind: input, shape index: {}]   ;;  %s4990_s5 = inlined_call_operand.<no memory space> [shape: f32[1,1], index: 5, kind: input, shape index: {}]   ;;  %s4991_s6 = inlined_call_operand.vmem [shape: f32[8,1], index: 6, kind: output, shape index: {}]  }
   0x1   :  { %v11_v0 = vstv %s4990_s5 }
   0x2   :  { %12 = vst [vmem:[#allocation3] sm:$0x1] %v11_v0 }
   0x3   :  { %13 = vsyncpa [#allocation5], 0 }
   0x4   :  { %14 = vsyncpa [#allocation7], 0 }
   0x5   :  { %15 = vsyncpa [#allocation10], 0  ;;  %s4821_s23 = smov [#allocation6]   ;;  %s4705_s27 = scalar_lea.hbm %s4986_s1, 36864 }
   0x6   :  { %s31_s24 = sshll.u32 %s4821_s23, 4  ;;  %p4706_p0 = scmp.ne.s32.totalorder %s4986_s1, %s4705_s27  ;;  %s32_s24 = int_to_ptr.vmem [resolvable:$true] %s31_s24 }
   0x7   :  { %p4709_p1 = scmp.lt.u32.totalorder %s4705_s27, %s4986_s1 }
   0x9   :  { %p4711_p2 = pnand %p4709_p1, %p4706_p0 }
   0xb   :  { %4714 = shalt.err (!%p4711_p2)
}
   0xc   :  { %s4715_s5 = scalar_lea.vmem %s32_s24, 36864  ;;  %p4720_p4 = scmp.lt.s32.totalorder %s32_s24, %s32_s24 }
   0xd   :  { %p4716_p3 = scmp.ne.s32.totalorder %s32_s24, %s4715_s5  ;;  %p4721_p5 = scmp.lt.s32.totalorder %s4715_s5, %s4715_s5 }
   0xf   :  { %p4722_p6 = por %p4721_p5, %p4720_p4 }
  0x11   :  { %p4723_p7 = pnand %p4722_p6, %p4716_p3 }
  0x13   :  { %4726 = shalt.err (!%p4723_p7)
}
  0x14   :  { %s4822_s8 = smov 384   ;;  %s4823_s9 = smov 24  }
  0x15   :  { %37 = dma.hbm_to_vmem [thread:$0]  %s4986_s1, 36864, %s32_s24, [#allocation7], %s4822_s8, %s4822_s8, %s4823_s9  }
  0x16   :  { %s4824_s12 = smov [#allocation9]   ;;  %s4825_s14 = smov [#allocation4]  }
  0x17   :  { %s56_s13 = sshll.u32 %s4824_s12, 4  ;;  %s22_s15 = sshll.u32 %s4825_s14, 4  ;;  %s57_s13 = int_to_ptr.vmem [resolvable:$true] %s56_s13  ;;  %s23_s15 = int_to_ptr.vmem [resolvable:$true] %s22_s15 }
  0x18   :  { %s4727_s18 = scalar_lea.hbm %s4988_s3, 48 }
  0x19   :  { %p4728_p8 = scmp.ne.s32.totalorder %s4988_s3, %s4727_s18  ;;  %p4731_p9 = scmp.lt.u32.totalorder %s4727_s18, %s4988_s3 }
  0x1b   :  { %p4733_p10 = pnand %p4731_p9, %p4728_p8 }
  0x1d   :  { %4736 = shalt.err (!%p4733_p10)
}
  0x1e   :  { %s4737_s1 = scalar_lea.vmem %s57_s13, 48  ;;  %s4741_s23 = scalar_lea.vmem %s57_s13, 64 }
  0x1f   :  { %p4738_p11 = scmp.ne.s32.totalorder %s57_s13, %s4737_s1  ;;  %p4742_p12 = scmp.lt.s32.totalorder %s57_s13, %s57_s13 }
  0x20   :  { %p4743_p13 = scmp.lt.s32.totalorder %s4741_s23, %s4737_s1 }
  0x22   :  { %p4744_p0 = por %p4743_p13, %p4742_p12 }
  0x24   :  { %p4745_p1 = pnand %p4744_p0, %p4738_p11 }
  0x26   :  { %4748 = shalt.err (!%p4745_p1)
}
  0x27   :  { %59 = dma.hbm_to_vmem [thread:$0]  %s4988_s3, 48, %s57_s13, [#allocation10]  }
  0x28   :  { %s4749_s28 = scalar_lea.hbm %s4985_s0, 384 }
  0x29   :  { %p4750_p2 = scmp.ne.s32.totalorder %s4985_s0, %s4749_s28  ;;  %p4753_p3 = scmp.lt.u32.totalorder %s4749_s28, %s4985_s0 }
  0x2b   :  { %p4755_p4 = pnand %p4753_p3, %p4750_p2 }
  0x2d   :  { %4758 = shalt.err (!%p4755_p4)
}
  0x2e   :  { %s4759_s8 = scalar_lea.vmem %s23_s15, 384  ;;  %p4764_p6 = scmp.lt.s32.totalorder %s23_s15, %s23_s15 }
  0x2f   :  { %p4760_p5 = scmp.ne.s32.totalorder %s23_s15, %s4759_s8  ;;  %p4765_p7 = scmp.lt.s32.totalorder %s4759_s8, %s4759_s8 }
  0x31   :  { %p4766_p8 = por %p4765_p7, %p4764_p6 }
  0x33   :  { %p4767_p9 = pnand %p4766_p8, %p4760_p5 }
  0x35   :  { %4770 = shalt.err (!%p4767_p9)
}
  0x36   :  { %25 = dma.hbm_to_vmem [thread:$0]  %s4985_s0, 384, %s23_s15, [#allocation5]  }
  0x37   :  { %s4826_s10 = smov [#allocation8]   ;;  %s4771_s14 = scalar_lea.hbm %s4987_s2, 18432 }
  0x38   :  { %s43_s11 = sshll.u32 %s4826_s10, 4  ;;  %p4772_p10 = scmp.ne.s32.totalorder %s4987_s2, %s4771_s14  ;;  %s44_s11 = int_to_ptr.vmem [resolvable:$true] %s43_s11 }
  0x39   :  { %p4775_p11 = scmp.lt.u32.totalorder %s4771_s14, %s4987_s2 }
  0x3b   :  { %p4777_p12 = pnand %p4775_p11, %p4772_p10 }
  0x3d   :  { %4780 = shalt.err (!%p4777_p12)
}
  0x3e   :  { %s4781_s20 = scalar_lea.vmem %s44_s11, 18432  ;;  %p4786_p0 = scmp.lt.s32.totalorder %s44_s11, %s44_s11 }
  0x3f   :  { %p4782_p13 = scmp.ne.s32.totalorder %s44_s11, %s4781_s20  ;;  %p4787_p1 = scmp.lt.s32.totalorder %s4781_s20, %s4781_s20 }
  0x41   :  { %p4788_p2 = por %p4787_p1, %p4786_p0 }
  0x43   :  { %p4789_p3 = pnand %p4788_p2, %p4782_p13 }
  0x45   :  { %4792 = shalt.err (!%p4789_p3)
}
  0x46   :  { %s4827_s0 = smov 192   ;;  %s4828_s15 = smov 12  }
  0x47   :  { %49 = dma.hbm_to_vmem [thread:$0]  %s4987_s2, 18432, %s44_s11, [#allocation7], %s4827_s0, %s4827_s0, %s4828_s15  }
  0x48   :  { %s4829_s1 = smov [#allocation11]   ;;  %s4793_s26 = scalar_lea.hbm %s4989_s4, 48 }
  0x49   :  { %s66_s23 = sshll.u32 %s4829_s1, 4  ;;  %p4794_p4 = scmp.ne.s32.totalorder %s4989_s4, %s4793_s26  ;;  %s67_s23 = int_to_ptr.vmem [resolvable:$true] %s66_s23 }
  0x4a   :  { %p4797_p5 = scmp.lt.u32.totalorder %s4793_s26, %s4989_s4 }
  0x4c   :  { %p4799_p6 = pnand %p4797_p5, %p4794_p4 }
  0x4e   :  { %4802 = shalt.err (!%p4799_p6)
}
  0x4f   :  { %s4803_s7 = scalar_lea.vmem %s67_s23, 48  ;;  %s4807_s2 = scalar_lea.vmem %s67_s23, 64 }
  0x50   :  { %p4804_p7 = scmp.ne.s32.totalorder %s67_s23, %s4803_s7  ;;  %p4808_p8 = scmp.lt.s32.totalorder %s67_s23, %s67_s23 }
  0x51   :  { %p4809_p9 = scmp.lt.s32.totalorder %s4807_s2, %s4803_s7 }
  0x53   :  { %p4810_p10 = por %p4809_p9, %p4808_p8 }
  0x55   :  { %p4811_p11 = pnand %p4810_p10, %p4804_p7 }
  0x57   :  { %4814 = shalt.err (!%p4811_p11)
}
  0x58   :  { %69 = dma.hbm_to_vmem [thread:$0]  %s4989_s4, 48, %s67_s23, [#allocation10]  }
  0x59   :  { %4815 = dma.done.wait [#allocation5], 384  }
  0x5a   :  { %4816 = vsyncadd [#allocation5], 4294966912 }
  0x5b   :  { %4817 = dma.done.wait [#allocation7], 55296  }
  0x5c   :  { %4818 = vsyncadd [#allocation7], 4294912000 }
  0x5d   :  { %4819 = dma.done.wait [#allocation10], 96  }
  0x5e   :  { %4820 = vsyncadd [#allocation10], 4294967200  ;;  %v4071_v1 = vld [vmem:[#allocation6 + $0x4] ss:$24 sps:$4 sm:$0xff]   ;;  %v4075_v3 = vld [vmem:[#allocation6] ss:$24 sps:$4 sm:$0xff]  }
  0x5f   :  { %v4073_v2 = vld [vmem:[#allocation6 + $0xc] ss:$24 sps:$4 sm:$0xff]   ;;  %1856 = vmatprep.subr.bf16.mxu0 %v4071_v1  ;;  %v4076_v4 = vld [vmem:[#allocation6 + $0x8] ss:$24 sps:$4 sm:$0xff]   ;;  %v4079_v6 = vld [vmem:[#allocation6 + $0x3c] ss:$24 sps:$4 sm:$0xff]  }
  0x60   :  { %1979 = vmatprep.subr.bf16.mxu1 %v4073_v2  ;;  %v4077_v5 = vld [vmem:[#allocation6 + $0x34] ss:$24 sps:$4 sm:$0xff]   ;;  %1857 = vmatpush1.bf16.msra.mxu0 %v4075_v3  ;;  %v4081_v7 = vld [vmem:[#allocation6 + $0x30] ss:$24 sps:$4 sm:$0xff]   ;;  %v4083_v9 = vld [vmem:[#allocation6 + $0x64] ss:$24 sps:$4 sm:$0xff]  }
  0x61   :  { %1980 = vmatpush1.bf16.msra.mxu1 %v4076_v4  ;;  %1858 = vmatprep.subr.bf16.mxu0 %v4077_v5  ;;  %v4082_v8 = vld [vmem:[#allocation6 + $0x38] ss:$24 sps:$4 sm:$0xff]   ;;  %v4085_v10 = vld [vmem:[#allocation6 + $0x6c] ss:$24 sps:$4 sm:$0xff]   ;;  %v4088_v12 = vld [vmem:[#allocation6 + $0x68] ss:$24 sps:$4 sm:$0xff]  }
  0x62   :  { %1981 = vmatprep.subr.bf16.mxu1 %v4079_v6  ;;  %v4087_v11 = vld [vmem:[#allocation6 + $0x60] ss:$24 sps:$4 sm:$0xff]   ;;  %v4089_v13 = vld [vmem:[#allocation6 + $0x94] ss:$24 sps:$4 sm:$0xff]   ;;  %v4093_v15 = vld [vmem:[#allocation6 + $0x90] ss:$24 sps:$4 sm:$0xff]  }
  0x63   :  { %v4091_v14 = vld [vmem:[#allocation6 + $0x9c] ss:$24 sps:$4 sm:$0xff]   ;;  %v4094_v16 = vld [vmem:[#allocation6 + $0x98] ss:$24 sps:$4 sm:$0xff]   ;;  %v4097_v18 = vld [vmem:[#allocation6 + $0xcc] ss:$24 sps:$4 sm:$0xff]  }
  0x64   :  { %1859 = vmatpush1.bf16.msra.mxu0 %v4081_v7  ;;  %v4095_v17 = vld [vmem:[#allocation6 + $0xc4] ss:$24 sps:$4 sm:$0xff]   ;;  %v4099_v19 = vld [vmem:[#allocation6 + $0xc0] ss:$24 sps:$4 sm:$0xff]   ;;  %v4101_v21 = vld [vmem:[#allocation6 + $0xf4] ss:$24 sps:$4 sm:$0xff]  }
  0x65   :  { %1982 = vmatpush1.bf16.msra.mxu1 %v4082_v8  ;;  %1860 = vmatprep.subr.bf16.mxu0 %v4083_v9  ;;  %v4100_v20 = vld [vmem:[#allocation6 + $0xc8] ss:$24 sps:$4 sm:$0xff]   ;;  %v4103_v22 = vld [vmem:[#allocation6 + $0xfc] ss:$24 sps:$4 sm:$0xff]   ;;  %v4106_v24 = vld [vmem:[#allocation6 + $0xf8] ss:$24 sps:$4 sm:$0xff]  }
  0x66   :  { %1983 = vmatprep.subr.bf16.mxu1 %v4085_v10  ;;  %v4105_v23 = vld [vmem:[#allocation6 + $0xf0] ss:$24 sps:$4 sm:$0xff]   ;;  %v4107_v25 = vld [vmem:[#allocation6 + $0x124] ss:$24 sps:$4 sm:$0xff]   ;;  %v4111_v27 = vld [vmem:[#allocation6 + $0x120] ss:$24 sps:$4 sm:$0xff]  }
  0x67   :  { %v4109_v26 = vld [vmem:[#allocation6 + $0x12c] ss:$24 sps:$4 sm:$0xff]   ;;  %v4112_v28 = vld [vmem:[#allocation6 + $0x128] ss:$24 sps:$4 sm:$0xff]   ;;  %v4115_v30 = vld [vmem:[#allocation6 + $0x15c] ss:$24 sps:$4 sm:$0xff]  }
  0x68   :  { %1861 = vmatpush1.bf16.msra.mxu0 %v4087_v11  ;;  %v4113_v29 = vld [vmem:[#allocation6 + $0x154] ss:$24 sps:$4 sm:$0xff]   ;;  %v4117_v31 = vld [vmem:[#allocation6 + $0x150] ss:$24 sps:$4 sm:$0xff]   ;;  %v4119_v33 = vld [vmem:[#allocation6 + $0x184] ss:$24 sps:$4 sm:$0xff]  }
  0x69   :  { %1984 = vmatpush1.bf16.msra.mxu1 %v4088_v12  ;;  %1862 = vmatprep.subr.bf16.mxu0 %v4089_v13  ;;  %v4118_v32 = vld [vmem:[#allocation6 + $0x158] ss:$24 sps:$4 sm:$0xff]   ;;  %v4121_v34 = vld [vmem:[#allocation6 + $0x18c] ss:$24 sps:$4 sm:$0xff]   ;;  %v4124_v36 = vld [vmem:[#allocation6 + $0x188] ss:$24 sps:$4 sm:$0xff]  }
  0x6a   :  { %1985 = vmatprep.subr.bf16.mxu1 %v4091_v14  ;;  %v4123_v35 = vld [vmem:[#allocation6 + $0x180] ss:$24 sps:$4 sm:$0xff]   ;;  %v4125_v37 = vld [vmem:[#allocation6 + $0x1b4] ss:$24 sps:$4 sm:$0xff]   ;;  %v4129_v39 = vld [vmem:[#allocation6 + $0x1b0] ss:$24 sps:$4 sm:$0xff]  }
  0x6b   :  { %v4127_v38 = vld [vmem:[#allocation6 + $0x1bc] ss:$24 sps:$4 sm:$0xff]   ;;  %v4130_v40 = vld [vmem:[#allocation6 + $0x1b8] ss:$24 sps:$4 sm:$0xff]   ;;  %v4133_v42 = vld [vmem:[#allocation6 + $0x1ec] ss:$24 sps:$4 sm:$0xff]  }
  0x6c   :  { %1863 = vmatpush1.bf16.msra.mxu0 %v4093_v15  ;;  %v4131_v41 = vld [vmem:[#allocation6 + $0x1e4] ss:$24 sps:$4 sm:$0xff]   ;;  %v4135_v43 = vld [vmem:[#allocation6 + $0x1e0] ss:$24 sps:$4 sm:$0xff]   ;;  %v4137_v45 = vld [vmem:[#allocation6 + $0x214] ss:$24 sps:$4 sm:$0xff]  }
  0x6d   :  { %1986 = vmatpush1.bf16.msra.mxu1 %v4094_v16  ;;  %1864 = vmatprep.subr.bf16.mxu0 %v4095_v17  ;;  %v4136_v44 = vld [vmem:[#allocation6 + $0x1e8] ss:$24 sps:$4 sm:$0xff]   ;;  %v4139_v46 = vld [vmem:[#allocation6 + $0x21c] ss:$24 sps:$4 sm:$0xff]   ;;  %v4142_v50 = vld [vmem:[#allocation6 + $0x218] ss:$24 sps:$4 sm:$0xff]  }
  0x6e   :  { %1987 = vmatprep.subr.bf16.mxu1 %v4097_v18  ;;  %v104_v47 = vld [vmem:[#allocation4] sm:$0xff]  ;;  %v4143_v51 = vld [vmem:[#allocation6 + $0x244] ss:$24 sps:$4 sm:$0xff]   ;;  %v4147_v53 = vld [vmem:[#allocation6 + $0x240] ss:$24 sps:$4 sm:$0xff]   ;;  %vm3513_vm0 = vcmask 7168  }
  0x6f   :  { %v4141_v48 = vld [vmem:[#allocation6 + $0x210] ss:$24 sps:$4 sm:$0xff]   ;;  %v4928_v49 = vcombine.high %v104_v47, %v104_v47  ;;  %v4145_v52 = vld [vmem:[#allocation6 + $0x24c] ss:$24 sps:$4 sm:$0xff]   ;;  %v4151_v56 = vld [vmem:[#allocation6 + $0x27c] ss:$24 sps:$4 sm:$0xff]   ;;  %v4932_v6 = vcombine.low %v104_v47, %v104_v47 }
  0x70   :  { %1865 = vmatpush1.bf16.msra.mxu0 %v4099_v19  ;;  %v4148_v54 = vld [vmem:[#allocation6 + $0x248] ss:$24 sps:$4 sm:$0xff]   ;;  %v4149_v55 = vld [vmem:[#allocation6 + $0x274] ss:$24 sps:$4 sm:$0xff]   ;;  %v4154_v58 = vld [vmem:[#allocation6 + $0x278] ss:$24 sps:$4 sm:$0xff]  }
  0x71   :  { %1988 = vmatpush1.bf16.msra.mxu1 %v4100_v20  ;;  %1866 = vmatprep.subr.bf16.mxu0 %v4101_v21  ;;  %v4153_v57 = vld [vmem:[#allocation6 + $0x270] ss:$24 sps:$4 sm:$0xff]   ;;  %v4155_v59 = vld [vmem:[#allocation6 + $0x2a4] ss:$24 sps:$4 sm:$0xff]   ;;  %v4159_v61 = vld [vmem:[#allocation6 + $0x2a0] ss:$24 sps:$4 sm:$0xff]  }
  0x72   :  { %1989 = vmatprep.subr.bf16.mxu1 %v4103_v22  ;;  %1888 = vmatprep.mubr.bf16.mxu0 %v4928_v49  ;;  %v4157_v60 = vld [vmem:[#allocation6 + $0x2ac] ss:$24 sps:$4 sm:$0xff]   ;;  %v4160_v62 = vld [vmem:[#allocation6 + $0x2a8] ss:$24 sps:$4 sm:$0xff]   ;;  %v4163_v0 = vld [vmem:[#allocation6 + $0x2dc] ss:$24 sps:$4 sm:$0xff]  }
  0x73   :  { %2011 = vmatprep.mubr.bf16.mxu1 %v4928_v49  ;;  %v4161_v63 = vld [vmem:[#allocation6 + $0x2d4] ss:$24 sps:$4 sm:$0xff]   ;;  %v4165_v1 = vld [vmem:[#allocation6 + $0x2d0] ss:$24 sps:$4 sm:$0xff]   ;;  %v4170_v3 = vld [vmem:[#allocation6 + $0x304] ss:$24 sps:$4 sm:$0xff]  }
  0x74   :  { %1867 = vmatpush1.bf16.msra.mxu0 %v4105_v23  ;;  %v4166_v2 = vld [vmem:[#allocation6 + $0x2d8] ss:$24 sps:$4 sm:$0xff]   ;;  %v4173_v4 = vld [vmem:[#allocation6 + $0x30c] ss:$24 sps:$4 sm:$0xff]   ;;  %v4171_v7 = vld [vmem:[#allocation6 + $0x308] ss:$24 sps:$4 sm:$0xff]  }
  0x75   :  { %1990 = vmatpush1.bf16.msra.mxu1 %v4106_v24  ;;  %1868 = vmatprep.subr.bf16.mxu0 %v4107_v25  ;;  %v4168_v5 = vld [vmem:[#allocation6 + $0x300] ss:$24 sps:$4 sm:$0xff]   ;;  %v4177_v8 = vld [vmem:[#allocation6 + $0x334] ss:$24 sps:$4 sm:$0xff]   ;;  %v4175_v10 = vld [vmem:[#allocation6 + $0x330] ss:$24 sps:$4 sm:$0xff]  }
  0x76   :  { %1991 = vmatprep.subr.bf16.mxu1 %v4109_v26  ;;  %v4180_v9 = vld [vmem:[#allocation6 + $0x33c] ss:$24 sps:$4 sm:$0xff]   ;;  %v4178_v11 = vld [vmem:[#allocation6 + $0x338] ss:$24 sps:$4 sm:$0xff]   ;;  %v4186_v13 = vld [vmem:[#allocation6 + $0x36c] ss:$24 sps:$4 sm:$0xff]  }
  0x77   :  { %v4183_v12 = vld [vmem:[#allocation6 + $0x364] ss:$24 sps:$4 sm:$0xff]   ;;  %v4181_v14 = vld [vmem:[#allocation6 + $0x360] ss:$24 sps:$4 sm:$0xff]   ;;  %v4189_v16 = vld [vmem:[#allocation6 + $0x394] ss:$24 sps:$4 sm:$0xff]  }
  0x78   :  { %1869 = vmatpush1.bf16.msra.mxu0 %v4111_v27  ;;  %v4184_v15 = vld [vmem:[#allocation6 + $0x368] ss:$24 sps:$4 sm:$0xff]   ;;  %v4192_v17 = vld [vmem:[#allocation6 + $0x39c] ss:$24 sps:$4 sm:$0xff]   ;;  %v4190_v19 = vld [vmem:[#allocation6 + $0x398] ss:$24 sps:$4 sm:$0xff]  }
  0x79   :  { %1992 = vmatpush1.bf16.msra.mxu1 %v4112_v28  ;;  %1870 = vmatprep.subr.bf16.mxu0 %v4113_v29  ;;  %v4187_v18 = vld [vmem:[#allocation6 + $0x390] ss:$24 sps:$4 sm:$0xff]   ;;  %v4195_v20 = vld [vmem:[#allocation6 + $0x3c4] ss:$24 sps:$4 sm:$0xff]   ;;  %v4193_v22 = vld [vmem:[#allocation6 + $0x3c0] ss:$24 sps:$4 sm:$0xff]  }
  0x7a   :  { %1993 = vmatprep.subr.bf16.mxu1 %v4115_v30  ;;  %v4198_v21 = vld [vmem:[#allocation6 + $0x3cc] ss:$24 sps:$4 sm:$0xff]   ;;  %v4196_v23 = vld [vmem:[#allocation6 + $0x3c8] ss:$24 sps:$4 sm:$0xff]   ;;  %v4204_v25 = vld [vmem:[#allocation6 + $0x3fc] ss:$24 sps:$4 sm:$0xff]  }
  0x7b   :  { %v4201_v24 = vld [vmem:[#allocation6 + $0x3f4] ss:$24 sps:$4 sm:$0xff]   ;;  %v4199_v26 = vld [vmem:[#allocation6 + $0x3f0] ss:$24 sps:$4 sm:$0xff]   ;;  %v4207_v28 = vld [vmem:[#allocation6 + $0x424] ss:$24 sps:$4 sm:$0xff]  }
  0x7c   :  { %1871 = vmatpush1.bf16.msra.mxu0 %v4117_v31  ;;  %v4202_v27 = vld [vmem:[#allocation6 + $0x3f8] ss:$24 sps:$4 sm:$0xff]   ;;  %v4210_v29 = vld [vmem:[#allocation6 + $0x42c] ss:$24 sps:$4 sm:$0xff]  }
  0x7d   :  { %1994 = vmatpush1.bf16.msra.mxu1 %v4118_v32  ;;  %1872 = vmatprep.subr.bf16.mxu0 %v4119_v33  ;;  %v4936_v30 = vld [vmem:[#allocation4 + $0x8] sm:$0xff]  ;;  %v4205_v32 = vld [vmem:[#allocation6 + $0x420] ss:$24 sps:$4 sm:$0xff]   ;;  %v4234_v47 = vld [vmem:[#allocation6 + $0x4ec] ss:$24 sps:$4 sm:$0xff]  }
  0x7e   :  { %1995 = vmatprep.subr.bf16.mxu1 %v4121_v34  ;;  %v4940_v31 = vcombine.high %v4936_v30, %v4936_v30  ;;  %v4208_v33 = vld [vmem:[#allocation6 + $0x428] ss:$24 sps:$4 sm:$0xff]   ;;  %v4213_v34 = vld [vmem:[#allocation6 + $0x454] ss:$24 sps:$4 sm:$0xff]  }
  0x80   :  { %1873 = vmatpush1.bf16.msra.mxu0 %v4123_v35  ;;  %v4216_v35 = vld [vmem:[#allocation6 + $0x45c] ss:$24 sps:$4 sm:$0xff]  }
  0x81   :  { %1996 = vmatpush1.bf16.msra.mxu1 %v4124_v36  ;;  %1874 = vmatprep.subr.bf16.mxu0 %v4125_v37  ;;  %v4211_v36 = vld [vmem:[#allocation6 + $0x450] ss:$24 sps:$4 sm:$0xff]  }
  0x82   :  { %1997 = vmatprep.subr.bf16.mxu1 %v4127_v38  ;;  %v4214_v37 = vld [vmem:[#allocation6 + $0x458] ss:$24 sps:$4 sm:$0xff]   ;;  %v4219_v38 = vld [vmem:[#allocation6 + $0x484] ss:$24 sps:$4 sm:$0xff]  }
  0x84   :  { %1875 = vmatpush1.bf16.msra.mxu0 %v4129_v39  ;;  %v4222_v39 = vld [vmem:[#allocation6 + $0x48c] ss:$24 sps:$4 sm:$0xff]  }
  0x85   :  { %1998 = vmatpush1.bf16.msra.mxu1 %v4130_v40  ;;  %1876 = vmatprep.subr.bf16.mxu0 %v4131_v41  ;;  %v4217_v40 = vld [vmem:[#allocation6 + $0x480] ss:$24 sps:$4 sm:$0xff]  }
  0x86   :  { %1999 = vmatprep.subr.bf16.mxu1 %v4133_v42  ;;  %v4220_v41 = vld [vmem:[#allocation6 + $0x488] ss:$24 sps:$4 sm:$0xff]   ;;  %v4225_v42 = vld [vmem:[#allocation6 + $0x4b4] ss:$24 sps:$4 sm:$0xff]  }
  0x88   :  { %1877 = vmatpush1.bf16.msra.mxu0 %v4135_v43  ;;  %v4228_v43 = vld [vmem:[#allocation6 + $0x4bc] ss:$24 sps:$4 sm:$0xff]  }
  0x89   :  { %2000 = vmatpush1.bf16.msra.mxu1 %v4136_v44  ;;  %1878 = vmatprep.subr.bf16.mxu0 %v4137_v45  ;;  %v4223_v44 = vld [vmem:[#allocation6 + $0x4b0] ss:$24 sps:$4 sm:$0xff]  }
  0x8a   :  { %2001 = vmatprep.subr.bf16.mxu1 %v4139_v46  ;;  %v4226_v45 = vld [vmem:[#allocation6 + $0x4b8] ss:$24 sps:$4 sm:$0xff]   ;;  %v4231_v46 = vld [vmem:[#allocation6 + $0x4e4] ss:$24 sps:$4 sm:$0xff]  }
  0x8c   :  { %1879 = vmatpush1.bf16.msra.mxu0 %v4141_v48  ;;  %v4229_v48 = vld [vmem:[#allocation6 + $0x4e0] ss:$24 sps:$4 sm:$0xff]  }
  0x8d   :  { %2002 = vmatpush1.bf16.msra.mxu1 %v4142_v50  ;;  %1880 = vmatprep.subr.bf16.mxu0 %v4143_v51  ;;  %v4232_v50 = vld [vmem:[#allocation6 + $0x4e8] ss:$24 sps:$4 sm:$0xff]   ;;  %v4237_v51 = vld [vmem:[#allocation6 + $0x514] ss:$24 sps:$4 sm:$0xff]  }
  0x8e   :  { %2003 = vmatprep.subr.bf16.mxu1 %v4145_v52  ;;  %v4240_v52 = vld [vmem:[#allocation6 + $0x51c] ss:$24 sps:$4 sm:$0xff]  }
  0x90   :  { %1881 = vmatpush1.bf16.msra.mxu0 %v4147_v53  ;;  %v4235_v53 = vld [vmem:[#allocation6 + $0x510] ss:$24 sps:$4 sm:$0xff]  }
  0x91   :  { %2004 = vmatpush1.bf16.msra.mxu1 %v4148_v54  ;;  %1882 = vmatprep.subr.bf16.mxu0 %v4149_v55  ;;  %v4238_v54 = vld [vmem:[#allocation6 + $0x518] ss:$24 sps:$4 sm:$0xff]   ;;  %v4243_v55 = vld [vmem:[#allocation6 + $0x544] ss:$24 sps:$4 sm:$0xff]  }
  0x92   :  { %2005 = vmatprep.subr.bf16.mxu1 %v4151_v56  ;;  %v4246_v56 = vld [vmem:[#allocation6 + $0x54c] ss:$24 sps:$4 sm:$0xff]  }
  0x94   :  { %1883 = vmatpush1.bf16.msra.mxu0 %v4153_v57  ;;  %v4241_v57 = vld [vmem:[#allocation6 + $0x540] ss:$24 sps:$4 sm:$0xff]  }
  0x95   :  { %2006 = vmatpush1.bf16.msra.mxu1 %v4154_v58  ;;  %1884 = vmatprep.subr.bf16.mxu0 %v4155_v59  ;;  %v4244_v58 = vld [vmem:[#allocation6 + $0x548] ss:$24 sps:$4 sm:$0xff]   ;;  %v4249_v59 = vld [vmem:[#allocation6 + $0x574] ss:$24 sps:$4 sm:$0xff]  }
  0x96   :  { %2007 = vmatprep.subr.bf16.mxu1 %v4157_v60  ;;  %v4252_v60 = vld [vmem:[#allocation6 + $0x57c] ss:$24 sps:$4 sm:$0xff]  }
  0x98   :  { %1885 = vmatpush1.bf16.msra.mxu0 %v4159_v61  ;;  %v4247_v61 = vld [vmem:[#allocation6 + $0x570] ss:$24 sps:$4 sm:$0xff]  }
  0x99   :  { %2008 = vmatpush1.bf16.msra.mxu1 %v4160_v62  ;;  %1886 = vmatprep.subr.bf16.mxu0 %v4161_v63  ;;  %v4250_v62 = vld [vmem:[#allocation6 + $0x578] ss:$24 sps:$4 sm:$0xff]   ;;  %v4255_v63 = vld [vmem:[#allocation6 + $0x5a4] ss:$24 sps:$4 sm:$0xff]  }
  0x9a   :  { %2009 = vmatprep.subr.bf16.mxu1 %v4163_v0  ;;  %v4258_v0 = vld [vmem:[#allocation6 + $0x5ac] ss:$24 sps:$4 sm:$0xff]  }
  0x9c   :  { %1887 = vmatpush1.bf16.msra.mxu0 %v4165_v1  ;;  %v4253_v1 = vld [vmem:[#allocation6 + $0x5a0] ss:$24 sps:$4 sm:$0xff]  }
  0x9d   :  { %2010 = vmatpush1.bf16.msra.mxu1 %v4166_v2  ;;  %1897 = vmatprep.subr.bf16.mxu0 %v4170_v3  ;;  %v4256_v2 = vld [vmem:[#allocation6 + $0x5a8] ss:$24 sps:$4 sm:$0xff]   ;;  %v4261_v3 = vld [vmem:[#allocation6 + $0x5d4] ss:$24 sps:$4 sm:$0xff]  }
  0x9e   :  { %2020 = vmatprep.subr.bf16.mxu1 %v4173_v4  ;;  %v4264_v4 = vld [vmem:[#allocation6 + $0x5dc] ss:$24 sps:$4 sm:$0xff]  }
  0x9f   :  { %1889 = vmatmul.mubr.bf16.vlgmr.msra.gmra.mrb[0].mxu0 %v4932_v6 }
  0xa0   :  { %2012 = vmatmul.mubr.bf16.vlgmr.msra.gmra.mrb[0].mxu1 %v4932_v6  ;;  %1898 = vmatpush1.bf16.msra.mxu0 %v4168_v5  ;;  %v4259_v5 = vld [vmem:[#allocation6 + $0x5d0] ss:$24 sps:$4 sm:$0xff]  }
  0xa1   :  { %2021 = vmatpush1.bf16.msra.mxu1 %v4171_v7  ;;  %1899 = vmatprep.subr.bf16.mxu0 %v4177_v8  ;;  %v4262_v7 = vld [vmem:[#allocation6 + $0x5d8] ss:$24 sps:$4 sm:$0xff]   ;;  %v4269_v8 = vld [vmem:[#allocation6 + $0x604] ss:$24 sps:$4 sm:$0xff]  }
  0xa2   :  { %2022 = vmatprep.subr.bf16.mxu1 %v4180_v9  ;;  %1929 = vmatprep.mubr.bf16.mxu0 %v4940_v31  ;;  %v4272_v9 = vld [vmem:[#allocation6 + $0x60c] ss:$24 sps:$4 sm:$0xff]  }
  0xa3   :  { %2052 = vmatprep.mubr.bf16.mxu1 %v4940_v31 }
  0xa4   :  { %1900 = vmatpush1.bf16.msra.mxu0 %v4175_v10  ;;  %v4946_v10 = vcombine.low %v4936_v30, %v4936_v30  ;;  %v4294_v30 = vld [vmem:[#allocation6 + $0x6c8] ss:$24 sps:$4 sm:$0xff]  }
  0xa5   :  { %2023 = vmatpush1.bf16.msra.mxu1 %v4178_v11  ;;  %1901 = vmatprep.subr.bf16.mxu0 %v4183_v12  ;;  %v4267_v11 = vld [vmem:[#allocation6 + $0x600] ss:$24 sps:$4 sm:$0xff]  }
  0xa6   :  { %2024 = vmatprep.subr.bf16.mxu1 %v4186_v13  ;;  %v4270_v12 = vld [vmem:[#allocation6 + $0x608] ss:$24 sps:$4 sm:$0xff]   ;;  %v4275_v13 = vld [vmem:[#allocation6 + $0x634] ss:$24 sps:$4 sm:$0xff]  }
  0xa8   :  { %1902 = vmatpush1.bf16.msra.mxu0 %v4181_v14  ;;  %v4948_v14 = vld [vmem:[#allocation4 + $0x10] sm:$0xff] }
  0xa9   :  { %2025 = vmatpush1.bf16.msra.mxu1 %v4184_v15  ;;  %1903 = vmatprep.subr.bf16.mxu0 %v4189_v16  ;;  %v4278_v15 = vld [vmem:[#allocation6 + $0x63c] ss:$24 sps:$4 sm:$0xff]   ;;  %v4952_v16 = vcombine.high %v4948_v14, %v4948_v14 }
  0xaa   :  { %2026 = vmatprep.subr.bf16.mxu1 %v4192_v17  ;;  %v4273_v17 = vld [vmem:[#allocation6 + $0x630] ss:$24 sps:$4 sm:$0xff]  }
  0xac   :  { %1904 = vmatpush1.bf16.msra.mxu0 %v4187_v18  ;;  %v4276_v18 = vld [vmem:[#allocation6 + $0x638] ss:$24 sps:$4 sm:$0xff]  }
  0xad   :  { %2027 = vmatpush1.bf16.msra.mxu1 %v4190_v19  ;;  %1905 = vmatprep.subr.bf16.mxu0 %v4195_v20  ;;  %v4281_v19 = vld [vmem:[#allocation6 + $0x664] ss:$24 sps:$4 sm:$0xff]  }
  0xae   :  { %2028 = vmatprep.subr.bf16.mxu1 %v4198_v21  ;;  %v4284_v20 = vld [vmem:[#allocation6 + $0x66c] ss:$24 sps:$4 sm:$0xff]   ;;  %v4279_v21 = vld [vmem:[#allocation6 + $0x660] ss:$24 sps:$4 sm:$0xff]  }
  0xb0   :  { %1906 = vmatpush1.bf16.msra.mxu0 %v4193_v22  ;;  %v4282_v22 = vld [vmem:[#allocation6 + $0x668] ss:$24 sps:$4 sm:$0xff]  }
  0xb1   :  { %2029 = vmatpush1.bf16.msra.mxu1 %v4196_v23  ;;  %1907 = vmatprep.subr.bf16.mxu0 %v4201_v24  ;;  %v4287_v23 = vld [vmem:[#allocation6 + $0x694] ss:$24 sps:$4 sm:$0xff]  }
  0xb2   :  { %2030 = vmatprep.subr.bf16.mxu1 %v4204_v25  ;;  %v4290_v24 = vld [vmem:[#allocation6 + $0x69c] ss:$24 sps:$4 sm:$0xff]   ;;  %v4285_v25 = vld [vmem:[#allocation6 + $0x690] ss:$24 sps:$4 sm:$0xff]  }
  0xb4   :  { %1908 = vmatpush1.bf16.msra.mxu0 %v4199_v26  ;;  %v4288_v26 = vld [vmem:[#allocation6 + $0x698] ss:$24 sps:$4 sm:$0xff]  }
  0xb5   :  { %2031 = vmatpush1.bf16.msra.mxu1 %v4202_v27  ;;  %1909 = vmatprep.subr.bf16.mxu0 %v4207_v28  ;;  %v4293_v27 = vld [vmem:[#allocation6 + $0x6c4] ss:$24 sps:$4 sm:$0xff]  }
  0xb6   :  { %2032 = vmatprep.subr.bf16.mxu1 %v4210_v29  ;;  %v4296_v28 = vld [vmem:[#allocation6 + $0x6cc] ss:$24 sps:$4 sm:$0xff]   ;;  %v4291_v29 = vld [vmem:[#allocation6 + $0x6c0] ss:$24 sps:$4 sm:$0xff]  }
  0xb8   :  { %1910 = vmatpush1.bf16.msra.mxu0 %v4205_v32  ;;  %v4299_v32 = vld [vmem:[#allocation6 + $0x6f4] ss:$24 sps:$4 sm:$0xff]  }
  0xb9   :  { %2033 = vmatpush1.bf16.msra.mxu1 %v4208_v33  ;;  %1911 = vmatprep.subr.bf16.mxu0 %v4213_v34  ;;  %v4302_v33 = vld [vmem:[#allocation6 + $0x6fc] ss:$24 sps:$4 sm:$0xff]   ;;  %v4297_v34 = vld [vmem:[#allocation6 + $0x6f0] ss:$24 sps:$4 sm:$0xff]  }
  0xba   :  { %2034 = vmatprep.subr.bf16.mxu1 %v4216_v35  ;;  %v4300_v35 = vld [vmem:[#allocation6 + $0x6f8] ss:$24 sps:$4 sm:$0xff]  }
  0xbc   :  { %1912 = vmatpush1.bf16.msra.mxu0 %v4211_v36  ;;  %v4305_v36 = vld [vmem:[#allocation6 + $0x724] ss:$24 sps:$4 sm:$0xff]  }
  0xbd   :  { %2035 = vmatpush1.bf16.msra.mxu1 %v4214_v37  ;;  %1913 = vmatprep.subr.bf16.mxu0 %v4219_v38  ;;  %v4308_v37 = vld [vmem:[#allocation6 + $0x72c] ss:$24 sps:$4 sm:$0xff]   ;;  %v4303_v38 = vld [vmem:[#allocation6 + $0x720] ss:$24 sps:$4 sm:$0xff]  }
  0xbe   :  { %2036 = vmatprep.subr.bf16.mxu1 %v4222_v39  ;;  %v4306_v39 = vld [vmem:[#allocation6 + $0x728] ss:$24 sps:$4 sm:$0xff]  }
  0xc0   :  { %1914 = vmatpush1.bf16.msra.mxu0 %v4217_v40  ;;  %v4311_v40 = vld [vmem:[#allocation6 + $0x754] ss:$24 sps:$4 sm:$0xff]  }
  0xc1   :  { %2037 = vmatpush1.bf16.msra.mxu1 %v4220_v41  ;;  %1915 = vmatprep.subr.bf16.mxu0 %v4225_v42  ;;  %v4314_v41 = vld [vmem:[#allocation6 + $0x75c] ss:$24 sps:$4 sm:$0xff]   ;;  %v4309_v42 = vld [vmem:[#allocation6 + $0x750] ss:$24 sps:$4 sm:$0xff]  }
  0xc2   :  { %2038 = vmatprep.subr.bf16.mxu1 %v4228_v43  ;;  %v4312_v43 = vld [vmem:[#allocation6 + $0x758] ss:$24 sps:$4 sm:$0xff]  }
  0xc4   :  { %1916 = vmatpush1.bf16.msra.mxu0 %v4223_v44  ;;  %v4317_v44 = vld [vmem:[#allocation6 + $0x784] ss:$24 sps:$4 sm:$0xff]  }
  0xc5   :  { %2039 = vmatpush1.bf16.msra.mxu1 %v4226_v45  ;;  %1917 = vmatprep.subr.bf16.mxu0 %v4231_v46  ;;  %v4320_v45 = vld [vmem:[#allocation6 + $0x78c] ss:$24 sps:$4 sm:$0xff]   ;;  %v4315_v46 = vld [vmem:[#allocation6 + $0x780] ss:$24 sps:$4 sm:$0xff]  }
  0xc6   :  { %2040 = vmatprep.subr.bf16.mxu1 %v4234_v47  ;;  %v4318_v47 = vld [vmem:[#allocation6 + $0x788] ss:$24 sps:$4 sm:$0xff]  }
  0xc8   :  { %1918 = vmatpush1.bf16.msra.mxu0 %v4229_v48  ;;  %v4323_v48 = vld [vmem:[#allocation6 + $0x7b4] ss:$24 sps:$4 sm:$0xff]  }
  0xc9   :  { %2041 = vmatpush1.bf16.msra.mxu1 %v4232_v50  ;;  %1919 = vmatprep.subr.bf16.mxu0 %v4237_v51  ;;  %v4326_v50 = vld [vmem:[#allocation6 + $0x7bc] ss:$24 sps:$4 sm:$0xff]   ;;  %v4321_v51 = vld [vmem:[#allocation6 + $0x7b0] ss:$24 sps:$4 sm:$0xff]  }
  0xca   :  { %2042 = vmatprep.subr.bf16.mxu1 %v4240_v52  ;;  %v4324_v52 = vld [vmem:[#allocation6 + $0x7b8] ss:$24 sps:$4 sm:$0xff]  }
  0xcc   :  { %1920 = vmatpush1.bf16.msra.mxu0 %v4235_v53  ;;  %v4329_v53 = vld [vmem:[#allocation6 + $0x7e4] ss:$24 sps:$4 sm:$0xff]  }
  0xcd   :  { %2043 = vmatpush1.bf16.msra.mxu1 %v4238_v54  ;;  %1921 = vmatprep.subr.bf16.mxu0 %v4243_v55  ;;  %v4332_v54 = vld [vmem:[#allocation6 + $0x7ec] ss:$24 sps:$4 sm:$0xff]   ;;  %v4327_v55 = vld [vmem:[#allocation6 + $0x7e0] ss:$24 sps:$4 sm:$0xff]  }
  0xce   :  { %2044 = vmatprep.subr.bf16.mxu1 %v4246_v56  ;;  %v4330_v56 = vld [vmem:[#allocation6 + $0x7e8] ss:$24 sps:$4 sm:$0xff]  }
  0xd0   :  { %1922 = vmatpush1.bf16.msra.mxu0 %v4241_v57  ;;  %v4335_v57 = vld [vmem:[#allocation6 + $0x814] ss:$24 sps:$4 sm:$0xff]  }
  0xd1   :  { %2045 = vmatpush1.bf16.msra.mxu1 %v4244_v58  ;;  %1923 = vmatprep.subr.bf16.mxu0 %v4249_v59  ;;  %v4338_v58 = vld [vmem:[#allocation6 + $0x81c] ss:$24 sps:$4 sm:$0xff]   ;;  %v4333_v59 = vld [vmem:[#allocation6 + $0x810] ss:$24 sps:$4 sm:$0xff]  }
  0xd2   :  { %2046 = vmatprep.subr.bf16.mxu1 %v4252_v60  ;;  %v4336_v60 = vld [vmem:[#allocation6 + $0x818] ss:$24 sps:$4 sm:$0xff]  }
  0xd4   :  { %1924 = vmatpush1.bf16.msra.mxu0 %v4247_v61  ;;  %v4341_v61 = vld [vmem:[#allocation6 + $0x844] ss:$24 sps:$4 sm:$0xff]  }
  0xd5   :  { %2047 = vmatpush1.bf16.msra.mxu1 %v4250_v62  ;;  %1925 = vmatprep.subr.bf16.mxu0 %v4255_v63  ;;  %v4344_v62 = vld [vmem:[#allocation6 + $0x84c] ss:$24 sps:$4 sm:$0xff]   ;;  %v4339_v63 = vld [vmem:[#allocation6 + $0x840] ss:$24 sps:$4 sm:$0xff]  }
  0xd6   :  { %2048 = vmatprep.subr.bf16.mxu1 %v4258_v0  ;;  %v4342_v0 = vld [vmem:[#allocation6 + $0x848] ss:$24 sps:$4 sm:$0xff]  }
  0xd8   :  { %1926 = vmatpush1.bf16.msra.mxu0 %v4253_v1  ;;  %v4347_v1 = vld [vmem:[#allocation6 + $0x874] ss:$24 sps:$4 sm:$0xff]  }
  0xd9   :  { %2049 = vmatpush1.bf16.msra.mxu1 %v4256_v2  ;;  %1927 = vmatprep.subr.bf16.mxu0 %v4261_v3  ;;  %v4350_v2 = vld [vmem:[#allocation6 + $0x87c] ss:$24 sps:$4 sm:$0xff]   ;;  %v4345_v3 = vld [vmem:[#allocation6 + $0x870] ss:$24 sps:$4 sm:$0xff]  }
  0xda   :  { %2050 = vmatprep.subr.bf16.mxu1 %v4264_v4  ;;  %v4348_v4 = vld [vmem:[#allocation6 + $0x878] ss:$24 sps:$4 sm:$0xff]  }
  0xdc   :  { %1928 = vmatpush1.bf16.msra.mxu0 %v4259_v5  ;;  %v4353_v5 = vld [vmem:[#allocation6 + $0x8a4] ss:$24 sps:$4 sm:$0xff]  }
  0xdd   :  { %2051 = vmatpush1.bf16.msra.mxu1 %v4262_v7  ;;  %1938 = vmatprep.subr.bf16.mxu0 %v4269_v8  ;;  %v4356_v7 = vld [vmem:[#allocation6 + $0x8ac] ss:$24 sps:$4 sm:$0xff]   ;;  %v4351_v8 = vld [vmem:[#allocation6 + $0x8a0] ss:$24 sps:$4 sm:$0xff]  }
  0xde   :  { %2061 = vmatprep.subr.bf16.mxu1 %v4272_v9  ;;  %v4354_v9 = vld [vmem:[#allocation6 + $0x8a8] ss:$24 sps:$4 sm:$0xff]  }
  0xdf   :  { %1930 = vmatmul.mubr.bf16.vlgmr.msra.gmra.mrb[0].mxu0 %v4946_v10 }
  0xe0   :  { %2053 = vmatmul.mubr.bf16.vlgmr.msra.gmra.mrb[0].mxu1 %v4946_v10  ;;  %1939 = vmatpush1.bf16.msra.mxu0 %v4267_v11  ;;  %v4359_v11 = vld [vmem:[#allocation6 + $0x8d4] ss:$24 sps:$4 sm:$0xff]  }
  0xe1   :  { %2062 = vmatpush1.bf16.msra.mxu1 %v4270_v12  ;;  %1940 = vmatprep.subr.bf16.mxu0 %v4275_v13  ;;  %v4362_v12 = vld [vmem:[#allocation6 + $0x8dc] ss:$24 sps:$4 sm:$0xff]   ;;  %v4357_v13 = vld [vmem:[#allocation6 + $0x8d0] ss:$24 sps:$4 sm:$0xff]  }
  0xe2   :  { %2063 = vmatprep.subr.bf16.mxu1 %v4278_v15  ;;  %1970 = vmatprep.mubr.bf16.mxu0 %v4952_v16  ;;  %v4360_v15 = vld [vmem:[#allocation6 + $0x8d8] ss:$24 sps:$4 sm:$0xff]  }
  0xe3   :  { %2093 = vmatprep.mubr.bf16.mxu1 %v4952_v16 }
  0xe4   :  { %1941 = vmatpush1.bf16.msra.mxu0 %v4273_v17  ;;  %v4367_v17 = vld [vmem:[#allocation6 + $0x14] ss:$24 sps:$4 sm:$0xff]  }
  0xe5   :  { %2064 = vmatpush1.bf16.msra.mxu1 %v4276_v18  ;;  %1942 = vmatprep.subr.bf16.mxu0 %v4281_v19  ;;  %v4960_v18 = vcombine.low %v4948_v14, %v4948_v14  ;;  %v4365_v19 = vld [vmem:[#allocation6 + $0x10] ss:$24 sps:$4 sm:$0xff]   ;;  %v4374_v14 = vld [vmem:[#allocation6 + $0xa0] ss:$24 sps:$4 sm:$0xff]  }
  0xe6   :  { %2065 = vmatprep.subr.bf16.mxu1 %v4284_v20  ;;  %v4370_v20 = vld [vmem:[#allocation6 + $0x44] ss:$24 sps:$4 sm:$0xff]  }
  0xe8   :  { %1943 = vmatpush1.bf16.msra.mxu0 %v4279_v21  ;;  %v4368_v21 = vld [vmem:[#allocation6 + $0x40] ss:$24 sps:$4 sm:$0xff]  }
  0xe9   :  { %2066 = vmatpush1.bf16.msra.mxu1 %v4282_v22  ;;  %1944 = vmatprep.subr.bf16.mxu0 %v4287_v23  ;;  %v4373_v22 = vld [vmem:[#allocation6 + $0x74] ss:$24 sps:$4 sm:$0xff]   ;;  %v4371_v23 = vld [vmem:[#allocation6 + $0x70] ss:$24 sps:$4 sm:$0xff]  }
  0xea   :  { %2067 = vmatprep.subr.bf16.mxu1 %v4290_v24  ;;  %v4376_v24 = vld [vmem:[#allocation6 + $0xa4] ss:$24 sps:$4 sm:$0xff]  }
  0xec   :  { %1945 = vmatpush1.bf16.msra.mxu0 %v4285_v25  ;;  %v4379_v25 = vld [vmem:[#allocation6 + $0xd4] ss:$24 sps:$4 sm:$0xff]  }
  0xed   :  { %2068 = vmatpush1.bf16.msra.mxu1 %v4288_v26  ;;  %1946 = vmatprep.subr.bf16.mxu0 %v4293_v27  ;;  %v4377_v26 = vld [vmem:[#allocation6 + $0xd0] ss:$24 sps:$4 sm:$0xff]   ;;  %v4382_v27 = vld [vmem:[#allocation6 + $0x104] ss:$24 sps:$4 sm:$0xff]  }
  0xee   :  { %2069 = vmatprep.subr.bf16.mxu1 %v4296_v28  ;;  %v4380_v28 = vld [vmem:[#allocation6 + $0x100] ss:$24 sps:$4 sm:$0xff]  }
  0xf0   :  { %1947 = vmatpush1.bf16.msra.mxu0 %v4291_v29  ;;  %v4385_v29 = vld [vmem:[#allocation6 + $0x134] ss:$24 sps:$4 sm:$0xff]  }
  0xf1   :  { %2070 = vmatpush1.bf16.msra.mxu1 %v4294_v30  ;;  %1948 = vmatprep.subr.bf16.mxu0 %v4299_v32  ;;  %v4383_v30 = vld [vmem:[#allocation6 + $0x130] ss:$24 sps:$4 sm:$0xff]  }
  0xf2   :  { %2071 = vmatprep.subr.bf16.mxu1 %v4302_v33  ;;  %v4481_v32 = vld [vmem:[#allocation8 + $0x4] ss:$12 sps:$4 sm:$0xff]  }
  0xf3   :  { %v4388_v33 = vld [vmem:[#allocation6 + $0x164] ss:$24 sps:$4 sm:$0xff]  }
  0xf4   :  { %1949 = vmatpush1.bf16.msra.mxu0 %v4297_v34  ;;  %v4386_v34 = vld [vmem:[#allocation6 + $0x160] ss:$24 sps:$4 sm:$0xff]  }
  0xf5   :  { %2072 = vmatpush1.bf16.msra.mxu1 %v4300_v35  ;;  %1950 = vmatprep.subr.bf16.mxu0 %v4305_v36  ;;  %v4485_v35 = vld [vmem:[#allocation8 + $0x18] ss:$12 sps:$4 sm:$0xff]   ;;  %v4487_v36 = vld [vmem:[#allocation8 + $0x1c] ss:$12 sps:$4 sm:$0xff]  }
  0xf6   :  { %2073 = vmatprep.subr.bf16.mxu1 %v4308_v37  ;;  %v4391_v37 = vld [vmem:[#allocation6 + $0x194] ss:$24 sps:$4 sm:$0xff]  }
  0xf8   :  { %1951 = vmatpush1.bf16.msra.mxu0 %v4303_v38  ;;  %v4389_v38 = vld [vmem:[#allocation6 + $0x190] ss:$24 sps:$4 sm:$0xff]  }
  0xf9   :  { %2074 = vmatpush1.bf16.msra.mxu1 %v4306_v39  ;;  %1952 = vmatprep.subr.bf16.mxu0 %v4311_v40  ;;  %v4491_v39 = vld [vmem:[#allocation8 + $0x30] ss:$12 sps:$4 sm:$0xff]   ;;  %v4493_v40 = vld [vmem:[#allocation8 + $0x34] ss:$12 sps:$4 sm:$0xff]  }
  0xfa   :  { %2075 = vmatprep.subr.bf16.mxu1 %v4314_v41  ;;  %v4394_v41 = vld [vmem:[#allocation6 + $0x1c4] ss:$24 sps:$4 sm:$0xff]  }
  0xfc   :  { %1953 = vmatpush1.bf16.msra.mxu0 %v4309_v42  ;;  %v4392_v42 = vld [vmem:[#allocation6 + $0x1c0] ss:$24 sps:$4 sm:$0xff]  }
  0xfd   :  { %2076 = vmatpush1.bf16.msra.mxu1 %v4312_v43  ;;  %1954 = vmatprep.subr.bf16.mxu0 %v4317_v44  ;;  %v4497_v43 = vld [vmem:[#allocation8 + $0x48] ss:$12 sps:$4 sm:$0xff]   ;;  %v4499_v44 = vld [vmem:[#allocation8 + $0x4c] ss:$12 sps:$4 sm:$0xff]  }
  0xfe   :  { %2077 = vmatprep.subr.bf16.mxu1 %v4320_v45  ;;  %v4397_v45 = vld [vmem:[#allocation6 + $0x1f4] ss:$24 sps:$4 sm:$0xff]  }
 0x100   :  { %1955 = vmatpush1.bf16.msra.mxu0 %v4315_v46  ;;  %v4395_v46 = vld [vmem:[#allocation6 + $0x1f0] ss:$24 sps:$4 sm:$0xff]  }
 0x101   :  { %2078 = vmatpush1.bf16.msra.mxu1 %v4318_v47  ;;  %1956 = vmatprep.subr.bf16.mxu0 %v4323_v48  ;;  %v4503_v47 = vld [vmem:[#allocation8 + $0x60] ss:$12 sps:$4 sm:$0xff]   ;;  %v4505_v48 = vld [vmem:[#allocation8 + $0x64] ss:$12 sps:$4 sm:$0xff]  }
 0x102   :  { %2079 = vmatprep.subr.bf16.mxu1 %v4326_v50  ;;  %v4400_v50 = vld [vmem:[#allocation6 + $0x224] ss:$24 sps:$4 sm:$0xff]  }
 0x104   :  { %1957 = vmatpush1.bf16.msra.mxu0 %v4321_v51  ;;  %v4398_v51 = vld [vmem:[#allocation6 + $0x220] ss:$24 sps:$4 sm:$0xff]  }
 0x105   :  { %2080 = vmatpush1.bf16.msra.mxu1 %v4324_v52  ;;  %1958 = vmatprep.subr.bf16.mxu0 %v4329_v53  ;;  %v4509_v52 = vld [vmem:[#allocation8 + $0x78] ss:$12 sps:$4 sm:$0xff]   ;;  %v4511_v53 = vld [vmem:[#allocation8 + $0x7c] ss:$12 sps:$4 sm:$0xff]  }
 0x106   :  { %2081 = vmatprep.subr.bf16.mxu1 %v4332_v54  ;;  %v4403_v54 = vld [vmem:[#allocation6 + $0x254] ss:$24 sps:$4 sm:$0xff]  }
 0x108   :  { %1959 = vmatpush1.bf16.msra.mxu0 %v4327_v55  ;;  %v4401_v55 = vld [vmem:[#allocation6 + $0x250] ss:$24 sps:$4 sm:$0xff]  }
 0x109   :  { %2082 = vmatpush1.bf16.msra.mxu1 %v4330_v56  ;;  %1960 = vmatprep.subr.bf16.mxu0 %v4335_v57  ;;  %v4515_v56 = vld [vmem:[#allocation8 + $0x90] ss:$12 sps:$4 sm:$0xff]   ;;  %v4517_v57 = vld [vmem:[#allocation8 + $0x94] ss:$12 sps:$4 sm:$0xff]  }
 0x10a   :  { %2083 = vmatprep.subr.bf16.mxu1 %v4338_v58  ;;  %v4406_v58 = vld [vmem:[#allocation6 + $0x284] ss:$24 sps:$4 sm:$0xff]  }
 0x10c   :  { %1961 = vmatpush1.bf16.msra.mxu0 %v4333_v59  ;;  %v4404_v59 = vld [vmem:[#allocation6 + $0x280] ss:$24 sps:$4 sm:$0xff]  }
 0x10d   :  { %2084 = vmatpush1.bf16.msra.mxu1 %v4336_v60  ;;  %1962 = vmatprep.subr.bf16.mxu0 %v4341_v61  ;;  %v4521_v60 = vld [vmem:[#allocation8 + $0xa8] ss:$12 sps:$4 sm:$0xff]   ;;  %v4523_v61 = vld [vmem:[#allocation8 + $0xac] ss:$12 sps:$4 sm:$0xff]  }
 0x10e   :  { %2085 = vmatprep.subr.bf16.mxu1 %v4344_v62  ;;  %v4409_v62 = vld [vmem:[#allocation6 + $0x2b4] ss:$24 sps:$4 sm:$0xff]  }
 0x110   :  { %1963 = vmatpush1.bf16.msra.mxu0 %v4339_v63  ;;  %v4407_v63 = vld [vmem:[#allocation6 + $0x2b0] ss:$24 sps:$4 sm:$0xff]  }
 0x111   :  { %2086 = vmatpush1.bf16.msra.mxu1 %v4342_v0  ;;  %1964 = vmatprep.subr.bf16.mxu0 %v4347_v1  ;;  %v4527_v0 = vld [vmem:[#allocation8 + $0xc0] ss:$12 sps:$4 sm:$0xff]   ;;  %v4529_v1 = vld [vmem:[#allocation8 + $0xc4] ss:$12 sps:$4 sm:$0xff]  }
 0x112   :  { %2087 = vmatprep.subr.bf16.mxu1 %v4350_v2  ;;  %v4412_v2 = vld [vmem:[#allocation6 + $0x2e4] ss:$24 sps:$4 sm:$0xff]  }
 0x114   :  { %1965 = vmatpush1.bf16.msra.mxu0 %v4345_v3  ;;  %v4410_v3 = vld [vmem:[#allocation6 + $0x2e0] ss:$24 sps:$4 sm:$0xff]  }
 0x115   :  { %2088 = vmatpush1.bf16.msra.mxu1 %v4348_v4  ;;  %1966 = vmatprep.subr.bf16.mxu0 %v4353_v5  ;;  %v4533_v4 = vld [vmem:[#allocation8 + $0xd8] ss:$12 sps:$4 sm:$0xff]   ;;  %v4535_v5 = vld [vmem:[#allocation8 + $0xdc] ss:$12 sps:$4 sm:$0xff]  }
 0x116   :  { %2089 = vmatprep.subr.bf16.mxu1 %v4356_v7  ;;  %v4415_v7 = vld [vmem:[#allocation6 + $0x314] ss:$24 sps:$4 sm:$0xff]  }
 0x118   :  { %1967 = vmatpush1.bf16.msra.mxu0 %v4351_v8  ;;  %v4413_v8 = vld [vmem:[#allocation6 + $0x310] ss:$24 sps:$4 sm:$0xff]  }
 0x119   :  { %2090 = vmatpush1.bf16.msra.mxu1 %v4354_v9  ;;  %1968 = vmatprep.subr.bf16.mxu0 %v4359_v11  ;;  %v4539_v9 = vld [vmem:[#allocation8 + $0xf0] ss:$12 sps:$4 sm:$0xff]   ;;  %v4541_v11 = vld [vmem:[#allocation8 + $0xf4] ss:$12 sps:$4 sm:$0xff]  }
 0x11a   :  { %2091 = vmatprep.subr.bf16.mxu1 %v4362_v12  ;;  %v4418_v12 = vld [vmem:[#allocation6 + $0x344] ss:$24 sps:$4 sm:$0xff]  }
 0x11c   :  { %1969 = vmatpush1.bf16.msra.mxu0 %v4357_v13  ;;  %v4416_v13 = vld [vmem:[#allocation6 + $0x340] ss:$24 sps:$4 sm:$0xff]  }
 0x11d   :  { %2092 = vmatpush1.bf16.msra.mxu1 %v4360_v15  ;;  %2102 = vmatprep.subr.bf16.mxu0 %v4367_v17  ;;  %v4544_v15 = vld [vmem:[#allocation8 + $0x108] ss:$12 sps:$4 sm:$0xff]   ;;  %v4546_v17 = vld [vmem:[#allocation8 + $0x10c] ss:$12 sps:$4 sm:$0xff]  }
 0x11e   :  { %3231 = vmatprep.subr.bf16.mxu1 %v4481_v32  ;;  %v4564_v32 = vld [vmem:[#allocation8 + $0x168] ss:$12 sps:$4 sm:$0xff]  }
 0x11f   :  { %1971 = vmatmul.mubr.bf16.vlgmr.msra.gmra.mrb[0].mxu0 %v4960_v18 }
 0x120   :  { %2094 = vmatmul.mubr.bf16.vlgmr.msra.gmra.mrb[0].mxu1 %v4960_v18  ;;  %2103 = vmatpush1.bf16.msra.mxu0 %v4365_v19  ;;  %v4421_v19 = vld [vmem:[#allocation6 + $0x374] ss:$24 sps:$4 sm:$0xff]  }
 0x121   :  { %2134 = vmatprep.mubr.bf16.mxu0 %v4928_v49  ;;  %2104 = vmatprep.subr.bf16.mxu0 %v4370_v20  ;;  %v4479_v49 = vld [vmem:[#allocation8] ss:$12 sps:$4 sm:$0xff]   ;;  %v4419_v20 = vld [vmem:[#allocation6 + $0x370] ss:$24 sps:$4 sm:$0xff]  }
 0x122   :  { %3232 = vmatpush1.bf16.msra.mxu1 %v4479_v49  ;;  %v4433_v49 = vld [vmem:[#allocation6 + $0x434] ss:$24 sps:$4 sm:$0xff]  }
 0x123   :  { %3233 = vmatprep.subr.bf16.mxu1 %v4487_v36  ;;  %v4434_v36 = vld [vmem:[#allocation6 + $0x460] ss:$24 sps:$4 sm:$0xff]  }
 0x124   :  { %2105 = vmatpush1.bf16.msra.mxu0 %v4368_v21  ;;  %v4549_v21 = vld [vmem:[#allocation8 + $0x120] ss:$12 sps:$4 sm:$0xff]  }
 0x125   :  { %2106 = vmatprep.subr.bf16.mxu0 %v4373_v22  ;;  %v4551_v22 = vld [vmem:[#allocation8 + $0x124] ss:$12 sps:$4 sm:$0xff]  }
 0x126   :  { %3234 = vmatpush1.bf16.msra.mxu1 %v4485_v35  ;;  %v4436_v35 = vld [vmem:[#allocation6 + $0x464] ss:$24 sps:$4 sm:$0xff]  }
 0x127   :  { %3235 = vmatprep.subr.bf16.mxu1 %v4493_v40  ;;  %v4440_v40 = vld [vmem:[#allocation6 + $0x4c0] ss:$24 sps:$4 sm:$0xff]  }
 0x128   :  { %2107 = vmatpush1.bf16.msra.mxu0 %v4371_v23  ;;  %v4424_v23 = vld [vmem:[#allocation6 + $0x3a4] ss:$24 sps:$4 sm:$0xff]  }
 0x129   :  { %2108 = vmatprep.subr.bf16.mxu0 %v4376_v24  ;;  %v4554_v24 = vld [vmem:[#allocation8 + $0x138] ss:$12 sps:$4 sm:$0xff]  }
 0x12a   :  { %3236 = vmatpush1.bf16.msra.mxu1 %v4491_v39  ;;  %v4442_v39 = vld [vmem:[#allocation6 + $0x4c4] ss:$24 sps:$4 sm:$0xff]  }
 0x12b   :  { %3237 = vmatprep.subr.bf16.mxu1 %v4499_v44  ;;  %v4446_v44 = vld [vmem:[#allocation6 + $0x520] ss:$24 sps:$4 sm:$0xff]  }
 0x12c   :  { %2109 = vmatpush1.bf16.msra.mxu0 %v4374_v14  ;;  %v4556_v14 = vld [vmem:[#allocation8 + $0x13c] ss:$12 sps:$4 sm:$0xff]  }
 0x12d   :  { %2110 = vmatprep.subr.bf16.mxu0 %v4379_v25  ;;  %v4425_v25 = vld [vmem:[#allocation6 + $0x3d0] ss:$24 sps:$4 sm:$0xff]  }
 0x12e   :  { %3238 = vmatpush1.bf16.msra.mxu1 %v4497_v43  ;;  %v4448_v43 = vld [vmem:[#allocation6 + $0x524] ss:$24 sps:$4 sm:$0xff]  }
 0x12f   :  { %3239 = vmatprep.subr.bf16.mxu1 %v4505_v48  ;;  %v4452_v48 = vld [vmem:[#allocation6 + $0x580] ss:$24 sps:$4 sm:$0xff]  }
 0x130   :  { %2111 = vmatpush1.bf16.msra.mxu0 %v4377_v26  ;;  %v4559_v26 = vld [vmem:[#allocation8 + $0x150] ss:$12 sps:$4 sm:$0xff]  }
 0x131   :  { %2112 = vmatprep.subr.bf16.mxu0 %v4382_v27  ;;  %v4561_v27 = vld [vmem:[#allocation8 + $0x154] ss:$12 sps:$4 sm:$0xff]  }
 0x132   :  { %3240 = vmatpush1.bf16.msra.mxu1 %v4503_v47  ;;  %v4454_v47 = vld [vmem:[#allocation6 + $0x584] ss:$24 sps:$4 sm:$0xff]  }
 0x133   :  { %3241 = vmatprep.subr.bf16.mxu1 %v4511_v53  ;;  %v4458_v53 = vld [vmem:[#allocation6 + $0x5e0] ss:$24 sps:$4 sm:$0xff]  }
 0x134   :  { %2113 = vmatpush1.bf16.msra.mxu0 %v4380_v28  ;;  %v4430_v28 = vld [vmem:[#allocation6 + $0x404] ss:$24 sps:$4 sm:$0xff]  }
 0x135   :  { %2114 = vmatprep.subr.bf16.mxu0 %v4385_v29  ;;  %v4428_v29 = vld [vmem:[#allocation6 + $0x400] ss:$24 sps:$4 sm:$0xff]  }
 0x136   :  { %3242 = vmatpush1.bf16.msra.mxu1 %v4509_v52  ;;  %v4460_v52 = vld [vmem:[#allocation6 + $0x5e4] ss:$24 sps:$4 sm:$0xff]  }
 0x137   :  { %3243 = vmatprep.subr.bf16.mxu1 %v4517_v57  ;;  %v4464_v57 = vld [vmem:[#allocation6 + $0x640] ss:$24 sps:$4 sm:$0xff]  }
 0x138   :  { %2115 = vmatpush1.bf16.msra.mxu0 %v4383_v30  ;;  %v4566_v30 = vld [vmem:[#allocation8 + $0x16c] ss:$12 sps:$4 sm:$0xff]  }
 0x139   :  { %2116 = vmatprep.subr.bf16.mxu0 %v4388_v33  ;;  %v4431_v33 = vld [vmem:[#allocation6 + $0x430] ss:$24 sps:$4 sm:$0xff]  }
 0x13a   :  { %3244 = vmatpush1.bf16.msra.mxu1 %v4515_v56  ;;  %v4466_v56 = vld [vmem:[#allocation6 + $0x644] ss:$24 sps:$4 sm:$0xff]  }
 0x13b   :  { %3245 = vmatprep.subr.bf16.mxu1 %v4523_v61  ;;  %v4470_v61 = vld [vmem:[#allocation6 + $0x6a0] ss:$24 sps:$4 sm:$0xff]  }
 0x13c   :  { %2117 = vmatpush1.bf16.msra.mxu0 %v4386_v34  ;;  %v4571_v34 = vld [vmem:[#allocation8 + $0x184] ss:$12 sps:$4 sm:$0xff]  }
 0x13d   :  { %2118 = vmatprep.subr.bf16.mxu0 %v4391_v37  ;;  %v4439_v37 = vld [vmem:[#allocation6 + $0x494] ss:$24 sps:$4 sm:$0xff]  }
 0x13e   :  { %3246 = vmatpush1.bf16.msra.mxu1 %v4521_v60  ;;  %v4472_v60 = vld [vmem:[#allocation6 + $0x6a4] ss:$24 sps:$4 sm:$0xff]  }
 0x13f   :  { %3247 = vmatprep.subr.bf16.mxu1 %v4529_v1  ;;  %v4484_v1 = vld [vmem:[#allocation6 + $0x734] ss:$24 sps:$4 sm:$0xff]  }
 0x140   :  { %2119 = vmatpush1.bf16.msra.mxu0 %v4389_v38  ;;  %v4437_v38 = vld [vmem:[#allocation6 + $0x490] ss:$24 sps:$4 sm:$0xff]  }
 0x141   :  { %2120 = vmatprep.subr.bf16.mxu0 %v4394_v41  ;;  %v4445_v41 = vld [vmem:[#allocation6 + $0x4f4] ss:$24 sps:$4 sm:$0xff]  }
 0x142   :  { %3248 = vmatpush1.bf16.msra.mxu1 %v4527_v0  ;;  %v4478_v0 = vld [vmem:[#allocation6 + $0x704] ss:$24 sps:$4 sm:$0xff]  }
 0x143   :  { %3249 = vmatprep.subr.bf16.mxu1 %v4535_v5  ;;  %v4494_v5 = vld [vmem:[#allocation6 + $0x790] ss:$24 sps:$4 sm:$0xff]  }
 0x144   :  { %2121 = vmatpush1.bf16.msra.mxu0 %v4392_v42  ;;  %v4443_v42 = vld [vmem:[#allocation6 + $0x4f0] ss:$24 sps:$4 sm:$0xff]  }
 0x145   :  { %2122 = vmatprep.subr.bf16.mxu0 %v4397_v45  ;;  %v4451_v45 = vld [vmem:[#allocation6 + $0x554] ss:$24 sps:$4 sm:$0xff]  }
 0x146   :  { %3250 = vmatpush1.bf16.msra.mxu1 %v4533_v4  ;;  %v4496_v4 = vld [vmem:[#allocation6 + $0x794] ss:$24 sps:$4 sm:$0xff]  }
 0x147   :  { %3251 = vmatprep.subr.bf16.mxu1 %v4541_v11  ;;  %v4506_v11 = vld [vmem:[#allocation6 + $0x7f0] ss:$24 sps:$4 sm:$0xff]  }
 0x148   :  { %2123 = vmatpush1.bf16.msra.mxu0 %v4395_v46  ;;  %v4449_v46 = vld [vmem:[#allocation6 + $0x550] ss:$24 sps:$4 sm:$0xff]  }
 0x149   :  { %2124 = vmatprep.subr.bf16.mxu0 %v4400_v50  ;;  %v4457_v50 = vld [vmem:[#allocation6 + $0x5b4] ss:$24 sps:$4 sm:$0xff]  }
 0x14a   :  { %3252 = vmatpush1.bf16.msra.mxu1 %v4539_v9  ;;  %v4508_v9 = vld [vmem:[#allocation6 + $0x7f4] ss:$24 sps:$4 sm:$0xff]  }
 0x14b   :  { %3253 = vmatprep.subr.bf16.mxu1 %v4546_v17  ;;  %v4518_v17 = vld [vmem:[#allocation6 + $0x850] ss:$24 sps:$4 sm:$0xff]  }
 0x14c   :  { %2125 = vmatpush1.bf16.msra.mxu0 %v4398_v51  ;;  %v4455_v51 = vld [vmem:[#allocation6 + $0x5b0] ss:$24 sps:$4 sm:$0xff]  }
 0x14d   :  { %2126 = vmatprep.subr.bf16.mxu0 %v4403_v54  ;;  %v4463_v54 = vld [vmem:[#allocation6 + $0x614] ss:$24 sps:$4 sm:$0xff]  }
 0x14e   :  { %3254 = vmatpush1.bf16.msra.mxu1 %v4544_v15  ;;  %v4520_v15 = vld [vmem:[#allocation6 + $0x854] ss:$24 sps:$4 sm:$0xff]  }
 0x14f   :  { %3255 = vmatprep.subr.bf16.mxu1 %v4551_v22  ;;  %v4530_v22 = vld [vmem:[#allocation6 + $0x8b0] ss:$24 sps:$4 sm:$0xff]  }
 0x150   :  { %2127 = vmatpush1.bf16.msra.mxu0 %v4401_v55  ;;  %v4461_v55 = vld [vmem:[#allocation6 + $0x610] ss:$24 sps:$4 sm:$0xff]  }
 0x151   :  { %2128 = vmatprep.subr.bf16.mxu0 %v4406_v58  ;;  %v4469_v58 = vld [vmem:[#allocation6 + $0x674] ss:$24 sps:$4 sm:$0xff]  }
 0x152   :  { %3256 = vmatpush1.bf16.msra.mxu1 %v4549_v21  ;;  %v4532_v21 = vld [vmem:[#allocation6 + $0x8b4] ss:$24 sps:$4 sm:$0xff]  }
 0x153   :  { %3257 = vmatprep.subr.bf16.mxu1 %v4556_v14  ;;  %v4543_v14 = vld [vmem:[#allocation8 + $0x8] ss:$12 sps:$4 sm:$0xff]  }
 0x154   :  { %2129 = vmatpush1.bf16.msra.mxu0 %v4404_v59  ;;  %v4467_v59 = vld [vmem:[#allocation6 + $0x670] ss:$24 sps:$4 sm:$0xff]  }
 0x155   :  { %2130 = vmatprep.subr.bf16.mxu0 %v4409_v62  ;;  %v4475_v62 = vld [vmem:[#allocation6 + $0x6d4] ss:$24 sps:$4 sm:$0xff]  }
 0x156   :  { %3258 = vmatpush1.bf16.msra.mxu1 %v4554_v24  ;;  %v4542_v24 = vld [vmem:[#allocation8 + $0xc8] ss:$12 sps:$4 sm:$0xff]  }
 0x157   :  { %3259 = vmatprep.subr.bf16.mxu1 %v4561_v27  ;;  %v4553_v27 = vld [vmem:[#allocation8 + $0x38] ss:$12 sps:$4 sm:$0xff]  }
 0x158   :  { %2131 = vmatpush1.bf16.msra.mxu0 %v4407_v63  ;;  %v4473_v63 = vld [vmem:[#allocation6 + $0x6d0] ss:$24 sps:$4 sm:$0xff]  }
 0x159   :  { %2132 = vmatprep.subr.bf16.mxu0 %v4412_v2  ;;  %v4490_v2 = vld [vmem:[#allocation6 + $0x764] ss:$24 sps:$4 sm:$0xff]  }
 0x15a   :  { %3260 = vmatpush1.bf16.msra.mxu1 %v4559_v26  ;;  %v4552_v26 = vld [vmem:[#allocation8 + $0xf8] ss:$12 sps:$4 sm:$0xff]  }
 0x15b   :  { %3261 = vmatprep.subr.bf16.mxu1 %v4566_v30  ;;  %v4562_v30 = vld [vmem:[#allocation8 + $0x128] ss:$12 sps:$4 sm:$0xff]  }
 0x15c   :  { %2133 = vmatpush1.bf16.msra.mxu0 %v4410_v3  ;;  %v4488_v3 = vld [vmem:[#allocation6 + $0x760] ss:$24 sps:$4 sm:$0xff]  }
 0x15d   :  { %2143 = vmatprep.subr.bf16.mxu0 %v4415_v7  ;;  %v4502_v7 = vld [vmem:[#allocation6 + $0x7c4] ss:$24 sps:$4 sm:$0xff]  }
 0x15e   :  { %3262 = vmatpush1.bf16.msra.mxu1 %v4564_v32  ;;  %v4567_v32 = vld [vmem:[#allocation8 + $0x140] ss:$12 sps:$4 sm:$0xff]  }
 0x15f   :  { %2135 = vmatmul.mubr.bf16.vlgmr.msra.gmra.mrb[4].mxu0 %v4932_v6  ;;  %v4422_v6 = vld [vmem:[#allocation6 + $0x3a0] ss:$24 sps:$4 sm:$0xff]   ;;  %3272 = vmatprep.subr.bf16.mxu1 %v4571_v34 }
 0x160   :  { %2144 = vmatpush1.bf16.msra.mxu0 %v4413_v8  ;;  %2175 = vmatprep.mubr.bf16.mxu0 %v4940_v31  ;;  %v4427_v31 = vld [vmem:[#allocation6 + $0x3d4] ss:$24 sps:$4 sm:$0xff]   ;;  %v4500_v8 = vld [vmem:[#allocation6 + $0x7c0] ss:$24 sps:$4 sm:$0xff]  }
 0x161   :  { %2145 = vmatprep.subr.bf16.mxu0 %v4418_v12  ;;  %v4514_v12 = vld [vmem:[#allocation6 + $0x824] ss:$24 sps:$4 sm:$0xff]  }
 0x164   :  { %2146 = vmatpush1.bf16.msra.mxu0 %v4416_v13  ;;  %v4512_v13 = vld [vmem:[#allocation6 + $0x820] ss:$24 sps:$4 sm:$0xff]  }
 0x165   :  { %2147 = vmatprep.subr.bf16.mxu0 %v4421_v19  ;;  %v4526_v19 = vld [vmem:[#allocation6 + $0x884] ss:$24 sps:$4 sm:$0xff]  }
 0x168   :  { %2148 = vmatpush1.bf16.msra.mxu0 %v4419_v20  ;;  %v4524_v20 = vld [vmem:[#allocation6 + $0x880] ss:$24 sps:$4 sm:$0xff]  }
 0x169   :  { %2149 = vmatprep.subr.bf16.mxu0 %v4424_v23  ;;  %v4538_v23 = vld [vmem:[#allocation6 + $0x8e4] ss:$24 sps:$4 sm:$0xff]  }
 0x16c   :  { %2150 = vmatpush1.bf16.msra.mxu0 %v4422_v6  ;;  %v4536_v6 = vld [vmem:[#allocation6 + $0x8e0] ss:$24 sps:$4 sm:$0xff]  }
 0x16d   :  { %2151 = vmatprep.subr.bf16.mxu0 %v4427_v31  ;;  %v4547_v31 = vld [vmem:[#allocation8 + $0xe0] ss:$12 sps:$4 sm:$0xff]  }
 0x170   :  { %2152 = vmatpush1.bf16.msra.mxu0 %v4425_v25  ;;  %v4548_v25 = vld [vmem:[#allocation8 + $0x20] ss:$12 sps:$4 sm:$0xff]  }
 0x171   :  { %2153 = vmatprep.subr.bf16.mxu0 %v4430_v28  ;;  %v4557_v28 = vld [vmem:[#allocation8 + $0x110] ss:$12 sps:$4 sm:$0xff]  }
 0x174   :  { %2154 = vmatpush1.bf16.msra.mxu0 %v4428_v29  ;;  %v4558_v29 = vld [vmem:[#allocation8 + $0x50] ss:$12 sps:$4 sm:$0xff]  }
 0x175   :  { %2155 = vmatprep.subr.bf16.mxu0 %v4433_v49  ;;  %v4563_v49 = vld [vmem:[#allocation8 + $0x68] ss:$12 sps:$4 sm:$0xff]  }
 0x178   :  { %2156 = vmatpush1.bf16.msra.mxu0 %v4431_v33  ;;  %v4568_v33 = vld [vmem:[#allocation8 + $0x80] ss:$12 sps:$4 sm:$0xff]  }
 0x179   :  { %2157 = vmatprep.subr.bf16.mxu0 %v4436_v35 }
 0x17c   :  { %2158 = vmatpush1.bf16.msra.mxu0 %v4434_v36 }
 0x17d   :  { %2159 = vmatprep.subr.bf16.mxu0 %v4439_v37 }
 0x180   :  { %2160 = vmatpush1.bf16.msra.mxu0 %v4437_v38 }
 0x181   :  { %2161 = vmatprep.subr.bf16.mxu0 %v4442_v39 }
 0x184   :  { %2162 = vmatpush1.bf16.msra.mxu0 %v4440_v40 }
 0x185   :  { %2163 = vmatprep.subr.bf16.mxu0 %v4445_v41  ;;  %v4569_v41 = vld [vmem:[#allocation8 + $0x180] ss:$12 sps:$4 sm:$0xff]  }
 0x188   :  { %2164 = vmatpush1.bf16.msra.mxu0 %v4443_v42 }
 0x189   :  { %2165 = vmatprep.subr.bf16.mxu0 %v4448_v43 }
 0x18c   :  { %2166 = vmatpush1.bf16.msra.mxu0 %v4446_v44 }
 0x18d   :  { %2167 = vmatprep.subr.bf16.mxu0 %v4451_v45  ;;  %v4573_v45 = vld [vmem:[#allocation8 + $0x98] ss:$12 sps:$4 sm:$0xff]  }
 0x190   :  { %2168 = vmatpush1.bf16.msra.mxu0 %v4449_v46  ;;  %v4576_v46 = vld [vmem:[#allocation8 + $0x19c] ss:$12 sps:$4 sm:$0xff]  }
 0x191   :  { %2169 = vmatprep.subr.bf16.mxu0 %v4454_v47 }
 0x194   :  { %2170 = vmatpush1.bf16.msra.mxu0 %v4452_v48  ;;  %v4577_v48 = vld [vmem:[#allocation8 + $0x170] ss:$12 sps:$4 sm:$0xff]  }
 0x195   :  { %2171 = vmatprep.subr.bf16.mxu0 %v4457_v50  ;;  %v4574_v50 = vld [vmem:[#allocation8 + $0x198] ss:$12 sps:$4 sm:$0xff]  }
 0x198   :  { %2172 = vmatpush1.bf16.msra.mxu0 %v4455_v51  ;;  %v4578_v51 = vld [vmem:[#allocation8 + $0xb0] ss:$12 sps:$4 sm:$0xff]  }
 0x199   :  { %2173 = vmatprep.subr.bf16.mxu0 %v4460_v52  ;;  %v4581_v52 = vld [vmem:[#allocation8 + $0x1b4] ss:$12 sps:$4 sm:$0xff]  }
 0x19c   :  { %2174 = vmatpush1.bf16.msra.mxu0 %v4458_v53  ;;  %v4648_v53 = vld [vmem:[#allocation8 + $0x3c8] ss:$12 sps:$4 sm:$0xff]  }
 0x19d   :  { %2184 = vmatprep.subr.bf16.mxu0 %v4463_v54  ;;  %v4579_v54 = vld [vmem:[#allocation8 + $0x1b0] ss:$12 sps:$4 sm:$0xff]  }
 0x19f   :  { %2176 = vmatmul.mubr.bf16.vlgmr.msra.gmra.mrb[4].mxu0 %v4946_v10  ;;  %v4476_v10 = vld [vmem:[#allocation6 + $0x700] ss:$24 sps:$4 sm:$0xff]  }
 0x1a0   :  { %2185 = vmatpush1.bf16.msra.mxu0 %v4461_v55  ;;  %2216 = vmatprep.mubr.bf16.mxu0 %v4952_v16  ;;  %v4482_v16 = vld [vmem:[#allocation6 + $0x730] ss:$24 sps:$4 sm:$0xff]   ;;  %v4584_v55 = vld [vmem:[#allocation8 + $0x1cc] ss:$12 sps:$4 sm:$0xff]  }
 0x1a1   :  { %2186 = vmatprep.subr.bf16.mxu0 %v4466_v56  ;;  %v4649_v56 = vld [vmem:[#allocation8 + $0x308] ss:$12 sps:$4 sm:$0xff]  }
 0x1a4   :  { %2187 = vmatpush1.bf16.msra.mxu0 %v4464_v57  ;;  %v4653_v57 = vld [vmem:[#allocation8 + $0x3e0] ss:$12 sps:$4 sm:$0xff]  }
 0x1a5   :  { %2188 = vmatprep.subr.bf16.mxu0 %v4469_v58  ;;  %v4582_v58 = vld [vmem:[#allocation8 + $0x1c8] ss:$12 sps:$4 sm:$0xff]  }
 0x1a8   :  { %2189 = vmatpush1.bf16.msra.mxu0 %v4467_v59  ;;  %v4587_v59 = vld [vmem:[#allocation8 + $0x1e4] ss:$12 sps:$4 sm:$0xff]  }
 0x1a9   :  { %2190 = vmatprep.subr.bf16.mxu0 %v4472_v60  ;;  %v4654_v60 = vld [vmem:[#allocation8 + $0x320] ss:$12 sps:$4 sm:$0xff]  }
 0x1ac   :  { %2191 = vmatpush1.bf16.msra.mxu0 %v4470_v61  ;;  %v4658_v61 = vld [vmem:[#allocation8 + $0x3f8] ss:$12 sps:$4 sm:$0xff]  }
 0x1ad   :  { %2192 = vmatprep.subr.bf16.mxu0 %v4475_v62  ;;  %v4585_v62 = vld [vmem:[#allocation8 + $0x1e0] ss:$12 sps:$4 sm:$0xff]  }
 0x1b0   :  { %2193 = vmatpush1.bf16.msra.mxu0 %v4473_v63  ;;  %v4590_v63 = vld [vmem:[#allocation8 + $0x1fc] ss:$12 sps:$4 sm:$0xff]  }
 0x1b1   :  { %2194 = vmatprep.subr.bf16.mxu0 %v4478_v0  ;;  %v4659_v0 = vld [vmem:[#allocation8 + $0x338] ss:$12 sps:$4 sm:$0xff]  }
 0x1b4   :  { %2195 = vmatpush1.bf16.msra.mxu0 %v4476_v10  ;;  %v4663_v10 = vld [vmem:[#allocation8 + $0x410] ss:$12 sps:$4 sm:$0xff]  }
 0x1b5   :  { %2196 = vmatprep.subr.bf16.mxu0 %v4484_v1  ;;  %v4588_v1 = vld [vmem:[#allocation8 + $0x1f8] ss:$12 sps:$4 sm:$0xff]  }
 0x1b8   :  { %2197 = vmatpush1.bf16.msra.mxu0 %v4482_v16  ;;  %v4593_v16 = vld [vmem:[#allocation8 + $0x214] ss:$12 sps:$4 sm:$0xff]  }
 0x1b9   :  { %2198 = vmatprep.subr.bf16.mxu0 %v4490_v2  ;;  %v4664_v2 = vld [vmem:[#allocation8 + $0x350] ss:$12 sps:$4 sm:$0xff]  }
 0x1bc   :  { %2199 = vmatpush1.bf16.msra.mxu0 %v4488_v3  ;;  %v4668_v3 = vld [vmem:[#allocation8 + $0x428] ss:$12 sps:$4 sm:$0xff]  }
 0x1bd   :  { %2200 = vmatprep.subr.bf16.mxu0 %v4496_v4  ;;  %v4591_v4 = vld [vmem:[#allocation8 + $0x210] ss:$12 sps:$4 sm:$0xff]  }
 0x1c0   :  { %2201 = vmatpush1.bf16.msra.mxu0 %v4494_v5  ;;  %v4596_v5 = vld [vmem:[#allocation8 + $0x22c] ss:$12 sps:$4 sm:$0xff]  }
 0x1c1   :  { %2202 = vmatprep.subr.bf16.mxu0 %v4502_v7  ;;  %v4669_v7 = vld [vmem:[#allocation8 + $0x368] ss:$12 sps:$4 sm:$0xff]  }
 0x1c4   :  { %2203 = vmatpush1.bf16.msra.mxu0 %v4500_v8  ;;  %v4673_v8 = vld [vmem:[#allocation8 + $0x440] ss:$12 sps:$4 sm:$0xff]  }
 0x1c5   :  { %2204 = vmatprep.subr.bf16.mxu0 %v4508_v9  ;;  %v4594_v9 = vld [vmem:[#allocation8 + $0x228] ss:$12 sps:$4 sm:$0xff]  }
 0x1c8   :  { %2205 = vmatpush1.bf16.msra.mxu0 %v4506_v11  ;;  %v4599_v11 = vld [vmem:[#allocation8 + $0x244] ss:$12 sps:$4 sm:$0xff]  }
 0x1c9   :  { %2206 = vmatprep.subr.bf16.mxu0 %v4514_v12  ;;  %v4674_v12 = vld [vmem:[#allocation8 + $0x380] ss:$12 sps:$4 sm:$0xff]  }
 0x1cc   :  { %2207 = vmatpush1.bf16.msra.mxu0 %v4512_v13  ;;  %v4678_v13 = vld [vmem:[#allocation8 + $0x458] ss:$12 sps:$4 sm:$0xff]  }
 0x1cd   :  { %2208 = vmatprep.subr.bf16.mxu0 %v4520_v15  ;;  %v4597_v15 = vld [vmem:[#allocation8 + $0x240] ss:$12 sps:$4 sm:$0xff]  }
 0x1d0   :  { %2209 = vmatpush1.bf16.msra.mxu0 %v4518_v17  ;;  %v4602_v17 = vld [vmem:[#allocation8 + $0x25c] ss:$12 sps:$4 sm:$0xff]  }
 0x1d1   :  { %2210 = vmatprep.subr.bf16.mxu0 %v4526_v19  ;;  %v4679_v19 = vld [vmem:[#allocation8 + $0x398] ss:$12 sps:$4 sm:$0xff]  }
 0x1d4   :  { %2211 = vmatpush1.bf16.msra.mxu0 %v4524_v20  ;;  %v4600_v20 = vld [vmem:[#allocation8 + $0x258] ss:$12 sps:$4 sm:$0xff]  }
 0x1d5   :  { %2212 = vmatprep.subr.bf16.mxu0 %v4532_v21  ;;  %v4605_v21 = vld [vmem:[#allocation8 + $0x274] ss:$12 sps:$4 sm:$0xff]  }
 0x1d8   :  { %2213 = vmatpush1.bf16.msra.mxu0 %v4530_v22  ;;  %v4603_v22 = vld [vmem:[#allocation8 + $0x270] ss:$12 sps:$4 sm:$0xff]  }
 0x1d9   :  { %2214 = vmatprep.subr.bf16.mxu0 %v4538_v23  ;;  %v4608_v23 = vld [vmem:[#allocation8 + $0x28c] ss:$12 sps:$4 sm:$0xff]  }
 0x1dc   :  { %2215 = vmatpush1.bf16.msra.mxu0 %v4536_v6  ;;  %v4606_v6 = vld [vmem:[#allocation8 + $0x288] ss:$12 sps:$4 sm:$0xff]  }
 0x1dd   :  { %3962 = vmatprep.subr.bf16.mxu0 %v4542_v24  ;;  %v4611_v24 = vld [vmem:[#allocation8 + $0x2a4] ss:$12 sps:$4 sm:$0xff]  }
 0x1df   :  { %2217 = vmatmul.mubr.bf16.vlgmr.msra.gmra.mrb[4].mxu0 %v4960_v18  ;;  %v4572_v18 = vld [vmem:[#allocation8 + $0x158] ss:$12 sps:$4 sm:$0xff]  }
 0x1e0   :  { %3963 = vmatpush3.bf16.msra.mxu0 %v4543_v14  ;;  %v4609_v14 = vld [vmem:[#allocation8 + $0x2a0] ss:$12 sps:$4 sm:$0xff]  }
 0x1e1   :  { %3964 = vmatprep.subr.bf16.mxu0 %v4547_v31  ;;  %v4614_v31 = vld [vmem:[#allocation8 + $0x2bc] ss:$12 sps:$4 sm:$0xff]  }
 0x1e4   :  { %3965 = vmatpush3.bf16.msra.mxu0 %v4548_v25  ;;  %v4612_v25 = vld [vmem:[#allocation8 + $0x2b8] ss:$12 sps:$4 sm:$0xff]  }
 0x1e5   :  { %3966 = vmatprep.subr.bf16.mxu0 %v4552_v26  ;;  %v4617_v26 = vld [vmem:[#allocation8 + $0x2d4] ss:$12 sps:$4 sm:$0xff]  }
 0x1e8   :  { %3967 = vmatpush3.bf16.msra.mxu0 %v4553_v27  ;;  %v4615_v27 = vld [vmem:[#allocation8 + $0x2d0] ss:$12 sps:$4 sm:$0xff]  }
 0x1e9   :  { %3968 = vmatprep.subr.bf16.mxu0 %v4557_v28  ;;  %v4620_v28 = vld [vmem:[#allocation8 + $0x2ec] ss:$12 sps:$4 sm:$0xff]  }
 0x1ec   :  { %3969 = vmatpush3.bf16.msra.mxu0 %v4558_v29  ;;  %v4618_v29 = vld [vmem:[#allocation8 + $0x2e8] ss:$12 sps:$4 sm:$0xff]  }
 0x1ed   :  { %3970 = vmatprep.subr.bf16.mxu0 %v4562_v30  ;;  %v4623_v30 = vld [vmem:[#allocation8 + $0x304] ss:$12 sps:$4 sm:$0xff]  }
 0x1f0   :  { %3971 = vmatpush3.bf16.msra.mxu0 %v4563_v49  ;;  %v4683_v49 = vld [vmem:[#allocation8 + $0x470] ss:$12 sps:$4 sm:$0xff]  }
 0x1f1   :  { %3972 = vmatprep.subr.bf16.mxu0 %v4567_v32  ;;  %v4684_v32 = vld [vmem:[#allocation8 + $0x3b0] ss:$12 sps:$4 sm:$0xff]  }
 0x1f2   :  { %v1972_v34 = vpop.f32.mrb[0].mxu0 }
 0x1f3   :  { %v4970_v35 = vpop.f32.mrb[0].mxu1  ;;  %v1974_v36 = vpop.f32.mrb[1].mxu0  ;;  %v2441_v42 = vpack.c.bf16 %v1972_v34, %v1972_v34  ;;  %v4626_v34 = vld [vmem:[#allocation8 + $0x31c] ss:$12 sps:$4 sm:$0xff]  }
 0x1f4   :  { %v2097_v37 = vpop.f32.mrb[1].mxu1  ;;  %v2442_v38 = vpack.c.bf16 %v1974_v36, %v1974_v36  ;;  %v1976_v39 = vpop.f32.mrb[2].mxu0  ;;  %3973 = vmatpush3.bf16.msra.mxu0 %v4568_v33  ;;  %v4621_v33 = vld [vmem:[#allocation8 + $0x300] ss:$12 sps:$4 sm:$0xff]   ;;  %v4624_v36 = vld [vmem:[#allocation8 + $0x318] ss:$12 sps:$4 sm:$0xff]  }
 0x1f5   :  { %v2099_v40 = vpop.f32.mrb[2].mxu1  ;;  %v1977_v43 = vpop.f32.mrb[3].mxu0  ;;  %3974 = vmatprep.subr.bf16.mxu0 %v4572_v18  ;;  %v4972_v47 = vpack.c.bf16 %v2097_v37, %v2097_v37  ;;  %v4977_v18 = vpack.c.bf16 %v4970_v35, %v4970_v35  ;;  %v4629_v37 = vld [vmem:[#allocation8 + $0x334] ss:$12 sps:$4 sm:$0xff]   ;;  %v4632_v39 = vld [vmem:[#allocation8 + $0x34c] ss:$12 sps:$4 sm:$0xff]  }
 0x1f6   :  { %v2100_v44 = vpop.f32.mrb[3].mxu1  ;;  %3263 = vmatprep.mubr.bf16.mxu1 %v2442_v38  ;;  %3386 = vmatprep.mubr.bf16.mxu0 %v2442_v38  ;;  %v4627_v38 = vld [vmem:[#allocation8 + $0x330] ss:$12 sps:$4 sm:$0xff]   ;;  %v4630_v40 = vld [vmem:[#allocation8 + $0x348] ss:$12 sps:$4 sm:$0xff]  }
 0x1f7   :  { %3264 = vmatmul.mubr.bf16.vlgmr.msra.gmra.mrb[4].mxu1 %v2441_v42  ;;  %v4633_v35 = vld [vmem:[#allocation8 + $0x360] ss:$12 sps:$4 sm:$0xff]   ;;  %v4636_v43 = vld [vmem:[#allocation8 + $0x378] ss:$12 sps:$4 sm:$0xff]  }
 0x1f8   :  { %3273 = vmatpush1.bf16.msra.mxu1 %v4569_v41  ;;  %3304 = vmatprep.mubr.bf16.mxu1 %v4972_v47  ;;  %v4635_v41 = vld [vmem:[#allocation8 + $0x364] ss:$12 sps:$4 sm:$0xff]   ;;  %v4641_v44 = vld [vmem:[#allocation8 + $0x394] ss:$12 sps:$4 sm:$0xff]  }
 0x1f9   :  { %3975 = vmatpush3.bf16.msra.mxu0 %v4573_v45  ;;  %3274 = vmatprep.subr.bf16.mxu1 %v4576_v46  ;;  %v4639_v45 = vld [vmem:[#allocation8 + $0x390] ss:$12 sps:$4 sm:$0xff]   ;;  %v4644_v46 = vld [vmem:[#allocation8 + $0x3ac] ss:$12 sps:$4 sm:$0xff]  }
 0x1fa   :  { %3976 = vmatprep.subr.bf16.mxu0 %v4577_v48  ;;  %v4642_v48 = vld [vmem:[#allocation8 + $0x3a8] ss:$12 sps:$4 sm:$0xff]  }
 0x1fc   :  { %3275 = vmatpush1.bf16.msra.mxu1 %v4574_v50  ;;  %v4647_v50 = vld [vmem:[#allocation8 + $0x3c4] ss:$12 sps:$4 sm:$0xff]  }
 0x1fd   :  { %3977 = vmatpush3.bf16.msra.mxu0 %v4578_v51  ;;  %3276 = vmatprep.subr.bf16.mxu1 %v4581_v52  ;;  %v4645_v51 = vld [vmem:[#allocation8 + $0x3c0] ss:$12 sps:$4 sm:$0xff]   ;;  %v4652_v52 = vld [vmem:[#allocation8 + $0x3dc] ss:$12 sps:$4 sm:$0xff]  }
 0x1fe   :  { %4006 = vmatprep.subr.bf16.mxu0 %v4648_v53  ;;  %v4650_v53 = vld [vmem:[#allocation8 + $0x3d8] ss:$12 sps:$4 sm:$0xff]  }
 0x200   :  { %3277 = vmatpush1.bf16.msra.mxu1 %v4579_v54  ;;  %3387 = vmatmul.mubr.bf16.vlgmr.msra.gmra.mrb[8].mxu0 %v2441_v42  ;;  %v4638_v42 = vld [vmem:[#allocation8 + $0x37c] ss:$12 sps:$4 sm:$0xff]   ;;  %v4657_v54 = vld [vmem:[#allocation8 + $0x3f4] ss:$12 sps:$4 sm:$0xff]  }
 0x201   :  { %3278 = vmatprep.subr.bf16.mxu1 %v4584_v55  ;;  %4007 = vmatpush3.bf16.msra.mxu0 %v4649_v56  ;;  %v4655_v55 = vld [vmem:[#allocation8 + $0x3f0] ss:$12 sps:$4 sm:$0xff]   ;;  %v4662_v56 = vld [vmem:[#allocation8 + $0x40c] ss:$12 sps:$4 sm:$0xff]  }
 0x202   :  { %4008 = vmatprep.subr.bf16.mxu0 %v4653_v57  ;;  %v4660_v57 = vld [vmem:[#allocation8 + $0x408] ss:$12 sps:$4 sm:$0xff]  }
 0x204   :  { %3279 = vmatpush1.bf16.msra.mxu1 %v4582_v58  ;;  %v4667_v58 = vld [vmem:[#allocation8 + $0x424] ss:$12 sps:$4 sm:$0xff]  }
 0x205   :  { %3280 = vmatprep.subr.bf16.mxu1 %v4587_v59  ;;  %4009 = vmatpush3.bf16.msra.mxu0 %v4654_v60  ;;  %v4665_v59 = vld [vmem:[#allocation8 + $0x420] ss:$12 sps:$4 sm:$0xff]   ;;  %v4672_v60 = vld [vmem:[#allocation8 + $0x43c] ss:$12 sps:$4 sm:$0xff]  }
 0x206   :  { %4010 = vmatprep.subr.bf16.mxu0 %v4658_v61  ;;  %v4670_v61 = vld [vmem:[#allocation8 + $0x438] ss:$12 sps:$4 sm:$0xff]  }
 0x208   :  { %3281 = vmatpush1.bf16.msra.mxu1 %v4585_v62  ;;  %v4677_v62 = vld [vmem:[#allocation8 + $0x454] ss:$12 sps:$4 sm:$0xff]  }
 0x209   :  { %3282 = vmatprep.subr.bf16.mxu1 %v4590_v63  ;;  %4011 = vmatpush3.bf16.msra.mxu0 %v4659_v0  ;;  %v4675_v63 = vld [vmem:[#allocation8 + $0x450] ss:$12 sps:$4 sm:$0xff]   ;;  %v4682_v0 = vld [vmem:[#allocation8 + $0x46c] ss:$12 sps:$4 sm:$0xff]  }
 0x20a   :  { %4012 = vmatprep.subr.bf16.mxu0 %v4663_v10  ;;  %v4680_v10 = vld [vmem:[#allocation8 + $0x468] ss:$12 sps:$4 sm:$0xff]  }
 0x20c   :  { %3283 = vmatpush1.bf16.msra.mxu1 %v4588_v1  ;;  %v4685_v1 = vld [vmem:[#allocation8 + $0x248] ss:$12 sps:$4 sm:$0xff]  }
 0x20d   :  { %3284 = vmatprep.subr.bf16.mxu1 %v4593_v16  ;;  %4013 = vmatpush3.bf16.msra.mxu0 %v4664_v2 }
 0x20e   :  { %4014 = vmatprep.subr.bf16.mxu0 %v4668_v3 }
 0x210   :  { %3285 = vmatpush1.bf16.msra.mxu1 %v4591_v4 }
 0x211   :  { %3286 = vmatprep.subr.bf16.mxu1 %v4596_v5  ;;  %4015 = vmatpush3.bf16.msra.mxu0 %v4669_v7  ;;  %v4686_v5 = vld [vmem:[#allocation8 + $0x188] ss:$12 sps:$4 sm:$0xff]  }
 0x212   :  { %4016 = vmatprep.subr.bf16.mxu0 %v4673_v8 }
 0x214   :  { %3287 = vmatpush1.bf16.msra.mxu1 %v4594_v9  ;;  %v4687_v9 = vld [vmem:[#allocation8 + $0x260] ss:$12 sps:$4 sm:$0xff]  }
 0x215   :  { %3288 = vmatprep.subr.bf16.mxu1 %v4599_v11  ;;  %4017 = vmatpush3.bf16.msra.mxu0 %v4674_v12  ;;  %v4688_v11 = vld [vmem:[#allocation8 + $0x1a0] ss:$12 sps:$4 sm:$0xff]   ;;  %v4689_v12 = vld [vmem:[#allocation8 + $0x278] ss:$12 sps:$4 sm:$0xff]  }
 0x216   :  { %4018 = vmatprep.subr.bf16.mxu0 %v4678_v13  ;;  %v4690_v13 = vld [vmem:[#allocation8 + $0x1b8] ss:$12 sps:$4 sm:$0xff]  }
 0x218   :  { %3289 = vmatpush1.bf16.msra.mxu1 %v4597_v15  ;;  %v4691_v15 = vld [vmem:[#allocation8 + $0x290] ss:$12 sps:$4 sm:$0xff]  }
 0x219   :  { %3290 = vmatprep.subr.bf16.mxu1 %v4602_v17  ;;  %4019 = vmatpush3.bf16.msra.mxu0 %v4679_v19  ;;  %v4692_v17 = vld [vmem:[#allocation8 + $0x1d0] ss:$12 sps:$4 sm:$0xff]   ;;  %v4693_v19 = vld [vmem:[#allocation8 + $0x2a8] ss:$12 sps:$4 sm:$0xff]  }
 0x21a   :  { %4020 = vmatprep.subr.bf16.mxu0 %v4683_v49 }
 0x21c   :  { %3291 = vmatpush1.bf16.msra.mxu1 %v4600_v20  ;;  %v4694_v20 = vld [vmem:[#allocation8 + $0x1e8] ss:$12 sps:$4 sm:$0xff]  }
 0x21d   :  { %3292 = vmatprep.subr.bf16.mxu1 %v4605_v21  ;;  %4021 = vmatpush3.bf16.msra.mxu0 %v4684_v32  ;;  %v4695_v21 = vld [vmem:[#allocation8 + $0x2c0] ss:$12 sps:$4 sm:$0xff]  }
 0x21e   :  { %v2432_v32 = vld [vmem:[#allocation9] sm:$0x7] }
 0x220   :  { %3293 = vmatpush1.bf16.msra.mxu1 %v4603_v22  ;;  %v4696_v22 = vld [vmem:[#allocation8 + $0x200] ss:$12 sps:$4 sm:$0xff]  }
 0x221   :  { %3294 = vmatprep.subr.bf16.mxu1 %v4608_v23  ;;  %v4697_v23 = vld [vmem:[#allocation8 + $0x2d8] ss:$12 sps:$4 sm:$0xff]  }
 0x224   :  { %3295 = vmatpush1.bf16.msra.mxu1 %v4606_v6  ;;  %v4699_v6 = vld [vmem:[#allocation8 + $0x2f0] ss:$12 sps:$4 sm:$0xff]  }
 0x225   :  { %3296 = vmatprep.subr.bf16.mxu1 %v4611_v24  ;;  %v4700_v24 = vld [vmem:[#allocation8 + $0x230] ss:$12 sps:$4 sm:$0xff]  }
 0x228   :  { %3297 = vmatpush1.bf16.msra.mxu1 %v4609_v14 }
 0x229   :  { %3298 = vmatprep.subr.bf16.mxu1 %v4614_v31 }
 0x22c   :  { %3299 = vmatpush1.bf16.msra.mxu1 %v4612_v25 }
 0x22d   :  { %3300 = vmatprep.subr.bf16.mxu1 %v4617_v26 }
 0x230   :  { %3301 = vmatpush1.bf16.msra.mxu1 %v4615_v27 }
 0x231   :  { %3302 = vmatprep.subr.bf16.mxu1 %v4620_v28  ;;  %v2448_v28 = vlaneseq }
 0x234   :  { %3303 = vmatpush1.bf16.msra.mxu1 %v4618_v29  ;;  %v2449_v29 = vshrl.u32 %v2448_v28, 7 }
 0x235   :  { %3313 = vmatprep.subr.bf16.mxu1 %v4623_v30 }
 0x236   :  { %v2450_v30 = vsub.s32 0, %v2449_v29  ;;  %v2454_v49 = vsub.s32 1, %v2449_v29 }
 0x237   :  { %3305 = vmatmul.mubr.bf16.vlgmr.msra.gmra.mrb[4].mxu1 %v4977_v18 }
 0x238   :  { %3314 = vmatpush1.bf16.msra.mxu1 %v4621_v33  ;;  %v2451_v33 = vrot.slane %v2432_v32, %v2450_v30 }
 0x239   :  { %3315 = vmatprep.subr.bf16.mxu1 %v4626_v34  ;;  %v2433_v34 = vld [vmem:[#allocation11] sm:$0x7] }
 0x23c   :  { %3316 = vmatpush1.bf16.msra.mxu1 %v4624_v36  ;;  %v2455_v36 = vrot.slane %v2432_v32, %v2454_v49 }
 0x23d   :  { %3317 = vmatprep.subr.bf16.mxu1 %v4629_v37 }
 0x240   :  { %3318 = vmatpush1.bf16.msra.mxu1 %v4627_v38 }
 0x241   :  { %3319 = vmatprep.subr.bf16.mxu1 %v4632_v39 }
 0x244   :  { %3320 = vmatpush1.bf16.msra.mxu1 %v4630_v40  ;;  %v3481_v40 = vrot.slane %v2433_v34, %v2450_v30 }
 0x245   :  { %3321 = vmatprep.subr.bf16.mxu1 %v4635_v41 }
 0x248   :  { %3322 = vmatpush1.bf16.msra.mxu1 %v4633_v35 }
 0x249   :  { %3323 = vmatprep.subr.bf16.mxu1 %v4638_v42 }
 0x24c   :  { %3324 = vmatpush1.bf16.msra.mxu1 %v4636_v43  ;;  %v3485_v43 = vrot.slane %v2433_v34, %v2454_v49 }
 0x24d   :  { %3325 = vmatprep.subr.bf16.mxu1 %v4641_v44 }
 0x250   :  { %3326 = vmatpush1.bf16.msra.mxu1 %v4639_v45 }
 0x251   :  { %3327 = vmatprep.subr.bf16.mxu1 %v4644_v46 }
 0x254   :  { %3328 = vmatpush1.bf16.msra.mxu1 %v4642_v48 }
 0x255   :  { %3329 = vmatprep.subr.bf16.mxu1 %v4647_v50 }
 0x258   :  { %3330 = vmatpush1.bf16.msra.mxu1 %v4645_v51 }
 0x259   :  { %3331 = vmatprep.subr.bf16.mxu1 %v4652_v52 }
 0x25c   :  { %3332 = vmatpush1.bf16.msra.mxu1 %v4650_v53 }
 0x25d   :  { %3333 = vmatprep.subr.bf16.mxu1 %v4657_v54 }
 0x260   :  { %3334 = vmatpush1.bf16.msra.mxu1 %v4655_v55  ;;  %v2458_v55 = vsub.s32 2, %v2449_v29 }
 0x261   :  { %3335 = vmatprep.subr.bf16.mxu1 %v4662_v56 }
 0x262   :  { %v2459_v56 = vrot.slane %v2432_v32, %v2458_v55 }
 0x264   :  { %3336 = vmatpush1.bf16.msra.mxu1 %v4660_v57 }
 0x265   :  { %3337 = vmatprep.subr.bf16.mxu1 %v4667_v58 }
 0x268   :  { %3338 = vmatpush1.bf16.msra.mxu1 %v4665_v59 }
 0x269   :  { %3339 = vmatprep.subr.bf16.mxu1 %v4672_v60 }
 0x26c   :  { %3340 = vmatpush1.bf16.msra.mxu1 %v4670_v61 }
 0x26d   :  { %3341 = vmatprep.subr.bf16.mxu1 %v4677_v62 }
 0x270   :  { %3342 = vmatpush1.bf16.msra.mxu1 %v4675_v63 }
 0x271   :  { %3343 = vmatprep.subr.bf16.mxu1 %v4682_v0 }
 0x274   :  { %3344 = vmatpush1.bf16.msra.mxu1 %v4680_v10  ;;  %v3489_v10 = vrot.slane %v2433_v34, %v2458_v55 }
 0x275   :  { %3984 = vmatprep.subr.bf16.mxu1 %v4685_v1 }
 0x2b2   :  { %v2218_v16 = vpop.f32.mrb[4].mxu0 }
 0x2b3   :  { %v2220_v2 = vpop.f32.mrb[5].mxu0  ;;  %v2445_v7 = vpack.c.bf16 %v2218_v16, %v2218_v16 }
 0x2b4   :  { %v2446_v3 = vpack.c.bf16 %v2220_v2, %v2220_v2  ;;  %v2222_v4 = vpop.f32.mrb[6].mxu0 }
 0x2b5   :  { %v2223_v8 = vpop.f32.mrb[7].mxu0 }
 0x2b6   :  { %3345 = vmatprep.mubr.bf16.mxu1 %v2446_v3  ;;  %3466 = vmatprep.mubr.bf16.mxu0 %v2446_v3  ;;  %v3960_v3 = vld [vmem:[#allocation3] ss:$0 sm:$0xff] }
 0x2b7   :  { %3346 = vmatmul.mubr.bf16.vlgmr.msra.gmra.mrb[4].mxu1 %v2445_v7  ;;  %3467 = vmatmul.mubr.bf16.vlgmr.msra.gmra.mrb[12].mxu0 %v2445_v7 }
 0x2b8   :  { %3985 = vmatpush3.bf16.msra.mxu1 %v4686_v5  ;;  %3426 = vmatprep.mubr.bf16.mxu1 %v4972_v47  ;;  %v4698_v47 = vld [vmem:[#allocation8 + $0x218] ss:$12 sps:$4 sm:$0xff]  }
 0x2b9   :  { %3986 = vmatprep.subr.bf16.mxu1 %v4687_v9 }
 0x2bc   :  { %3987 = vmatpush3.bf16.msra.mxu1 %v4688_v11 }
 0x2bd   :  { %3988 = vmatprep.subr.bf16.mxu1 %v4689_v12 }
 0x2c0   :  { %3989 = vmatpush3.bf16.msra.mxu1 %v4690_v13 }
 0x2c1   :  { %3990 = vmatprep.subr.bf16.mxu1 %v4691_v15 }
 0x2c4   :  { %3991 = vmatpush3.bf16.msra.mxu1 %v4692_v17 }
 0x2c5   :  { %3992 = vmatprep.subr.bf16.mxu1 %v4693_v19 }
 0x2c8   :  { %3993 = vmatpush3.bf16.msra.mxu1 %v4694_v20 }
 0x2c9   :  { %3994 = vmatprep.subr.bf16.mxu1 %v4695_v21 }
 0x2cc   :  { %3995 = vmatpush3.bf16.msra.mxu1 %v4696_v22 }
 0x2cd   :  { %3996 = vmatprep.subr.bf16.mxu1 %v4697_v23 }
 0x2d0   :  { %3997 = vmatpush3.bf16.msra.mxu1 %v4698_v47 }
 0x2d1   :  { %3998 = vmatprep.subr.bf16.mxu1 %v4699_v6 }
 0x2d3   :  { %v3978_v14 = vpop.f32.mrb[8].mxu0 }
 0x2d4   :  { %v3979_v31 = vpop.f32.mrb[9].mxu0  ;;  %3999 = vmatpush3.bf16.msra.mxu1 %v4700_v24 }
 0x2d5   :  { %v3980_v25 = vadd.f32 %v3979_v31, %v3978_v14  ;;  %v3981_v26 = vpop.f32.mrb[10].mxu0 }
 0x2d6   :  { %v3982_v27 = vpop.f32.mrb[11].mxu0 }
 0x2d7   :  { %3427 = vmatmul.mubr.bf16.vlgmr.msra.gmra.mrb[8].mxu1 %v4977_v18  ;;  %v3389_v59 = vadd.f32 %v3980_v25, %v2459_v56 }
 0x38a   :  { %v3347_v37 = vpop.f32.mrb[4].mxu1  ;;  %v4022_v38 = vpop.f32.mrb[12].mxu0 }
 0x38b   :  { %v4028_v39 = vadd.f32 %v3347_v37, %v2451_v33  ;;  %v3349_v41 = vpop.f32.mrb[5].mxu1  ;;  %v4023_v35 = vpop.f32.mrb[13].mxu0 }
 0x38c   :  { %v4029_v42 = vadd.f32 %v3349_v41, %v2455_v36  ;;  %v4024_v44 = vadd.f32 %v4023_v35, %v4022_v38  ;;  %v3351_v45 = vpop.f32.mrb[6].mxu1  ;;  %v4025_v46 = vpop.f32.mrb[14].mxu0 }
 0x38d   :  { %v3474_v18 = vmax.f32 %v4028_v39, 0.0  ;;  %v3352_v48 = vpop.f32.mrb[7].mxu1  ;;  %v4026_v50 = vpop.f32.mrb[15].mxu0 }
 0x38e   :  { %v3475_v51 = vmax.f32 %v4029_v42, 0.0 }
 0x38f   :  { %v3493_v52 = vmul.f32 %v3481_v40, %v3474_v18 }
 0x390   :  { %v3494_v53 = vmul.f32 %v3485_v43, %v3475_v51 }
 0x392   :  { %v3496_v54 = vadd.f32 %v3494_v53, %v3493_v52 }
 0x3aa   :  { %v4000_v57 = vpop.f32.mrb[8].mxu1 }
 0x3ab   :  { %v4001_v58 = vpop.f32.mrb[9].mxu1 }
 0x3ac   :  { %v4002_v60 = vadd.f32 %v4001_v58, %v4000_v57  ;;  %v4003_v61 = vpop.f32.mrb[10].mxu1 }
 0x3ad   :  { %v4004_v62 = vpop.f32.mrb[11].mxu1 }
 0x3ae   :  { %v3429_v63 = vadd.f32 %v4002_v60, %v3389_v59 }
 0x3b0   :  { %v3469_v0 = vadd.f32 %v4024_v44, %v3429_v63 }
 0x3b2   :  { %v3476_v1 = vmax.f32 %v3469_v0, 0.0 }
 0x3b4   :  { %v3495_v16 = vmul.f32 %v3489_v10, %v3476_v1 }
 0x3b6   :  { %v3497_v2 = vadd.f32 %v3496_v54, %v3495_v16 }
 0x3b8   :  { %3498 = vadd.xlane.f32.xlu0 %v3497_v2 }
 0x445   :  { %v3499_v4 = vpop.xlane.xlu0 %3498 }
 0x446   :  { %v3506_v5 = vadd.f32 %v3960_v3, %v3499_v4 }
 0x448   :  { %v3961_v7 = vmul.f32 -1.442695, %v3506_v5 }
 0x44a   :  { %4701 = vpow2.f32 %v3961_v7 }
 0x454   :  { %v4702_v8 = vpop.eup %4701 }
 0x455   :  { %v3510_v9 = vadd.f32 1.0, %v4702_v8 }
 0x457   :  { %4703 = vrcp.f32 %v3510_v9 }
 0x461   :  { %v4704_v11 = vpop.eup %4703 }
 0x462   :  { %3514 = vst.msk [vmem:[%s4991_s6] sm:$0xff] %vm3513_vm0, %v4704_v11 }
 0x463   :  { %3519 = vsyncpa [#allocation5], 1 }
 0x464   :  { %3520 = vsyncpa [#allocation7], 1 }
 0x465   :  { %3521 = vsyncpa [#allocation10], 1 }

</bundles_post_ra>
